<compile_context>
chip_gen: v6e
topology: v6e:2x2x1
jax: 0.10.0
libtpu: 0.0.40
codegen_flags: <defaults>
</compile_context>

<pallas_src>
import functools

import jax
import jax.numpy as jnp
from jax import lax
from jax.experimental import pallas as pl
from jax.experimental.pallas import tpu as pltpu

LANES = 128  # lane-pad all kernel channel dims to this


# ---------------------------------------------------------------------------
# Fused Conv3x3(pad=1) + BN(scale/shift) + ReLU + MaxPool2x2 kernel
# ---------------------------------------------------------------------------
def _conv_bn_relu_pool_kernel(x_ref, w_ref, scale_ref, shift_ref, o_ref, *,
                              H, W, Cin, Cout):
    # x_ref:     (H+2, W+2, Cin)    spatially padded input slab (one image)
    # w_ref:     (9, Cin, Cout)     folded conv weights, tap-major (dy*3+dx)
    # scale_ref: (1, Cout)          gamma / sqrt(var + eps)
    # shift_ref: (1, Cout)          beta - mean*scale + conv_bias*scale
    # o_ref:     (H//2, W//2, Cout) pooled output (one image)
    scale = scale_ref[...]
    shift = shift_ref[...]

    @pl.loop(0, H // 2)
    def _(r):
        # Two adjacent conv output rows (2r, 2r+1) computed as one (2W, Cout)
        # accumulation (9 taps = 9 MXU dots), then 2x2 max-pooled into one
        # pooled output row.
        acc = jnp.zeros((2 * W, Cout), jnp.float32)
        for dy in range(3):
            for dx in range(3):
                patch = x_ref[pl.ds(2 * r + dy, 2), pl.ds(dx, W), :]
                patch = patch.reshape(2 * W, Cin)
                acc = acc + jnp.dot(patch, w_ref[dy * 3 + dx],
                                    preferred_element_type=jnp.float32)
        y = jnp.maximum(acc * scale + shift, 0.0)           # conv + BN + ReLU
        y = jnp.maximum(y[:W], y[W:])                       # pool the 2 rows
        y = jnp.max(y.reshape(W // 2, 2, Cout), axis=1)     # pool column pairs
        o_ref[pl.ds(r, 1)] = y.reshape(1, W // 2, Cout)


def conv_bn_relu_pool(xp, w, scale, shift):
    """xp: (N, H+2, W+2, Cin) spatially padded NHWC. Returns (N, H/2, W/2, Cout)."""
    N, Hp, Wp, Cin = xp.shape
    H, W = Hp - 2, Wp - 2
    Cout = w.shape[-1]
    kern = functools.partial(_conv_bn_relu_pool_kernel,
                             H=H, W=W, Cin=Cin, Cout=Cout)
    return pl.pallas_call(
        kern,
        out_shape=jax.ShapeDtypeStruct((N, H // 2, W // 2, Cout), jnp.float32),
        grid=(N,),
        in_specs=[
            pl.BlockSpec((None, Hp, Wp, Cin), lambda n: (n, 0, 0, 0)),
            pl.BlockSpec((9, Cin, Cout), lambda n: (0, 0, 0)),
            pl.BlockSpec((1, Cout), lambda n: (0, 0)),
            pl.BlockSpec((1, Cout), lambda n: (0, 0)),
        ],
        out_specs=pl.BlockSpec((None, H // 2, W // 2, Cout),
                               lambda n: (n, 0, 0, 0)),
        compiler_params=pltpu.CompilerParams(
            dimension_semantics=("parallel",),
            vmem_limit_bytes=32 * 1024 * 1024,
        ),
    )(xp, w, scale, shift)


# ---------------------------------------------------------------------------
# FC kernel: out = x @ w + b   (output lane-padded to 128)
# ---------------------------------------------------------------------------
def _fc_kernel(x_ref, w_ref, b_ref, o_ref):
    acc = jnp.dot(x_ref[...], w_ref[...], preferred_element_type=jnp.float32)
    o_ref[...] = (acc + b_ref[...]).astype(o_ref.dtype)


def fc(x, w, b):
    M, K = x.shape
    _, Nout = w.shape
    TM = M if M <= 256 else 256
    return pl.pallas_call(
        _fc_kernel,
        out_shape=jax.ShapeDtypeStruct((M, Nout), jnp.float32),
        grid=(pl.cdiv(M, TM),),
        in_specs=[
            pl.BlockSpec((TM, K), lambda i: (i, 0)),
            pl.BlockSpec((K, Nout), lambda i: (0, 0)),
            pl.BlockSpec((1, Nout), lambda i: (0, 0)),
        ],
        out_specs=pl.BlockSpec((TM, Nout), lambda i: (i, 0)),
        compiler_params=pltpu.CompilerParams(
            dimension_semantics=("parallel",),
            vmem_limit_bytes=32 * 1024 * 1024,
        ),
    )(x, w, b)


# ---------------------------------------------------------------------------
# Parameters: PyTorch-equivalent raw params + packing into kernel layout
# ---------------------------------------------------------------------------
def init_params(key):
    k1, k2, k3, kb1, kb2, kb3 = jax.random.split(key, 6)
    p = {}
    # Conv2d(3, 8, 3, padding=1)  (OIHW)
    p["w1"] = jax.random.normal(k1, (8, 3, 3, 3), jnp.float32) * 0.1
    p["cb1"] = jax.random.normal(kb1, (8,), jnp.float32) * 0.1
    # BatchNorm2d(8) default init: gamma=1, beta=0, running mean=0, var=1
    p["g1"], p["be1"] = jnp.ones((8,), jnp.float32), jnp.zeros((8,), jnp.float32)
    p["m1"], p["v1"] = jnp.zeros((8,), jnp.float32), jnp.ones((8,), jnp.float32)
    # Conv2d(8, 16, 3, padding=1)
    p["w2"] = jax.random.normal(k2, (16, 8, 3, 3), jnp.float32) * 0.1
    p["cb2"] = jax.random.normal(kb2, (16,), jnp.float32) * 0.1
    p["g2"], p["be2"] = jnp.ones((16,), jnp.float32), jnp.zeros((16,), jnp.float32)
    p["m2"], p["v2"] = jnp.zeros((16,), jnp.float32), jnp.ones((16,), jnp.float32)
    # Linear(1024, 10) stored as (in, out)
    p["wfc"] = jax.random.normal(k3, (1024, 10), jnp.float32) * 0.05
    p["bfc"] = jax.random.normal(kb3, (10,), jnp.float32) * 0.05
    return p


def _pack_conv(w_oihw, bias, gamma, beta, mean, var, cin_pad, cout_pad, eps=1e-5):
    cout, cin, kh, kw = w_oihw.shape
    w = jnp.transpose(w_oihw, (2, 3, 1, 0))                      # (kh, kw, cin, cout)
    w = jnp.pad(w, ((0, 0), (0, 0), (0, cin_pad - cin), (0, cout_pad - cout)))
    w = w.reshape(kh * kw, cin_pad, cout_pad)
    scale = gamma / jnp.sqrt(var + eps)
    shift = beta - mean * scale + bias * scale                   # fold conv bias + BN
    scale = jnp.pad(scale, (0, cout_pad - cout)).reshape(1, cout_pad)
    shift = jnp.pad(shift, (0, cout_pad - cout)).reshape(1, cout_pad)
    return w, scale, shift


def pack_params(p, eps=1e-5):
    """Fold BN + conv bias and pad everything to the lane-dense kernel layout."""
    q = {}
    q["w1"], q["s1"], q["t1"] = _pack_conv(p["w1"], p["cb1"], p["g1"], p["be1"],
                                           p["m1"], p["v1"], 8, LANES, eps)
    q["w2"], q["s2"], q["t2"] = _pack_conv(p["w2"], p["cb2"], p["g2"], p["be2"],
                                           p["m2"], p["v2"], LANES, LANES, eps)
    # FC weight rows are in PyTorch NCHW-flatten order (c*64 + h*8 + w); permute
    # them to the NHWC-flatten order used here ((h*8 + w)*16 + c) and lane-pad
    # the 10 output columns to 128.
    wfc = p["wfc"].reshape(16, 8, 8, 10)                         # (c, h, w, out)
    wfc = jnp.transpose(wfc, (1, 2, 0, 3)).reshape(16 * 8 * 8, 10)
    q["wfc"] = jnp.pad(wfc, ((0, 0), (0, LANES - 10)))
    q["bfc"] = jnp.pad(p["bfc"], (0, LANES - 10)).reshape(1, LANES)
    return q


# ---------------------------------------------------------------------------
# Forward pass
# ---------------------------------------------------------------------------
# TODO(synk): BatchNorm2d uses inference-mode running stats (mean=0, var=1);
# PyTorch train()-mode batch statistics are not computed.
def convnet_forward(x_nchw, q):
    N = x_nchw.shape[0]
    x = jnp.transpose(x_nchw, (0, 2, 3, 1))                       # NHWC (N,32,32,3)
    # layer1: spatial halo pad (conv padding=1) + channel pad 3 -> 8.
    x = jnp.pad(x, ((0, 0), (1, 1), (1, 1), (0, 8 - x.shape[-1])))
    x = conv_bn_relu_pool(x, q["w1"], q["s1"], q["t1"])           # (N,16,16,128)
    # layer2: input already lane-padded to 128 channels (extras are exact zeros).
    x = jnp.pad(x, ((0, 0), (1, 1), (1, 1), (0, 0)))              # (N,18,18,128)
    x = conv_bn_relu_pool(x, q["w2"], q["s2"], q["t2"])           # (N,8,8,128)
    # flatten (FC weight was pre-permuted to NHWC order) and apply the FC layer.
    flat = x[..., :16].reshape(N, 8 * 8 * 16)                     # (N, 1024)
    out = fc(flat, q["wfc"], q["bfc"])                            # (N, 128)
    return out[:, :10]


# ---------------------------------------------------------------------------
# Pure-JAX reference (matches the PyTorch module in eval mode)
# ---------------------------------------------------------------------------
def reference_forward(x_nchw, p, eps=1e-5):
    def layer(x, w, b, g, be, m, v):
        y = lax.conv_general_dilated(x, w, (1, 1), "SAME",
                                     dimension_numbers=("NCHW", "OIHW", "NCHW"))
        y = y + b[None, :, None, None]
        y = (y - m[None, :, None, None]) / jnp.sqrt(v[None, :, None, None] + eps)
        y = y * g[None, :, None, None] + be[None, :, None, None]
        y = jnp.maximum(y, 0.0)
        return lax.reduce_window(y, -jnp.inf, lax.max,
                                 (1, 1, 2, 2), (1, 1, 2, 2), "VALID")
    y = layer(x_nchw, p["w1"], p["cb1"], p["g1"], p["be1"], p["m1"], p["v1"])
    y = layer(y, p["w2"], p["cb2"], p["g2"], p["be2"], p["m2"], p["v2"])
    flat = y.reshape(y.shape[0], -1)
    return flat @ p["wfc"] + p["bfc"]


if __name__ == "__main__":
    key = jax.random.PRNGKey(0)
    kx, kp = jax.random.split(key)
    # 1024 FC inputs = 16 channels * 8 * 8 after two 2x pools -> 32x32 input.
    x = jax.random.normal(kx, (2, 3, 32, 32), jnp.float32)
    raw = init_params(kp)
    packed = pack_params(raw)

    out = jax.jit(convnet_forward)(x, packed)
    out = jax.block_until_ready(out)
    assert out.shape == (2, 10) and out.dtype == jnp.float32

    ref = reference_forward(x, raw)
    assert jnp.allclose(out, ref, atol=1e-3, rtol=1e-3), (
        "mismatch vs reference, max|diff|="
        + str(float(jnp.max(jnp.abs(out - ref)))))
    print("KERNEL_OK")
</pallas_src>

<mosaic_0001>
module attributes {stable_mosaic.version = 11 : i64} {
  func.func @_conv_bn_relu_pool_kernel(%arg0: i32, %arg1: memref<1x34x34x8xf32, #tpu.memory_space<vmem>>, %arg2: memref<9x8x128xf32, #tpu.memory_space<vmem>>, %arg3: memref<1x128xf32, #tpu.memory_space<vmem>>, %arg4: memref<1x128xf32, #tpu.memory_space<vmem>>, %arg5: memref<1x16x16x128xf32, #tpu.memory_space<vmem>>) attributes {dimension_semantics = [#tpu.dimension_semantics<parallel>], iteration_bounds = array<i64: 2>, scalar_prefetch = 0 : i64, scratch_operands = 0 : i64, tpu.core_type = #tpu.core_type<tc>, window_params = [{transform_indices = @transform_0, window_bounds = array<i64: 1, 34, 34, 8>}, {pipeline_mode = #tpu.pipeline_mode<synchronous>, transform_indices = @transform_1, window_bounds = array<i64: 9, 8, 128>}, {pipeline_mode = #tpu.pipeline_mode<synchronous>, transform_indices = @transform_2, window_bounds = array<i64: 1, 128>}, {pipeline_mode = #tpu.pipeline_mode<synchronous>, transform_indices = @transform_3, window_bounds = array<i64: 1, 128>}, {transform_indices = @transform_4, window_bounds = array<i64: 1, 16, 16, 128>}]} {
    %c0 = arith.constant 0 : index
    %c0_0 = arith.constant 0 : index
    %0 = vector.load %arg3[%c0, %c0_0] : memref<1x128xf32, #tpu.memory_space<vmem>>, vector<1x128xf32>
    %c0_1 = arith.constant 0 : index
    %c0_2 = arith.constant 0 : index
    %1 = vector.load %arg4[%c0_1, %c0_2] : memref<1x128xf32, #tpu.memory_space<vmem>>, vector<1x128xf32>
    %c0_i32 = arith.constant 0 : i32
    %c16_i32 = arith.constant 16 : i32
    %2 = arith.addi %c0_i32, %c16_i32 : i32
    %c1_i32 = arith.constant 1 : i32
    scf.for %arg6 = %c0_i32 to %2 step %c1_i32  : i32 {
      %c1_i32_4 = arith.constant 1 : i32
      %3 = arith.muli %arg6, %c1_i32_4 : i32
      %c0_i32_5 = arith.constant 0 : i32
      %4 = arith.addi %c0_i32_5, %3 : i32
      %cst = arith.constant 0.000000e+00 : f32
      %5 = vector.broadcast %cst : f32 to vector<64x128xf32>
      %c2_i32 = arith.constant 2 : i32
      %6 = arith.muli %c2_i32, %4 : i32
      %c0_i32_6 = arith.constant 0 : i32
      %7 = arith.addi %6, %c0_i32_6 : i32
      %c0_7 = arith.constant 0 : index
      %8 = arith.index_cast %7 : i32 to index
      %c0_8 = arith.constant 0 : index
      %c0_9 = arith.constant 0 : index
      %9 = vector.load %arg1[%c0_7, %8, %c0_8, %c0_9] : memref<1x34x34x8xf32, #tpu.memory_space<vmem>>, vector<1x2x32x8xf32>
      %10 = vector.shape_cast %9 : vector<1x2x32x8xf32> to vector<2x32x8xf32>
      %11 = vector.shape_cast %10 : vector<2x32x8xf32> to vector<64x8xf32>
      %c0_10 = arith.constant 0 : index
      %c0_11 = arith.constant 0 : index
      %c0_12 = arith.constant 0 : index
      %12 = vector.load %arg2[%c0_10, %c0_11, %c0_12] : memref<9x8x128xf32, #tpu.memory_space<vmem>>, vector<1x8x128xf32>
      %13 = vector.shape_cast %12 : vector<1x8x128xf32> to vector<8x128xf32>
      %cst_13 = arith.constant dense<0.000000e+00> : vector<64x128xf32>
      %14 = tpu.matmul %11, %13, %cst_13 {dimension_numbers = #tpu.dot_dimension_numbers<[1], [0], [0], [1], [0, 0, 1, 1], [], []>} : vector<64x8xf32>, vector<8x128xf32>, vector<64x128xf32> -> vector<64x128xf32>
      %15 = arith.addf %5, %14 : vector<64x128xf32>
      %c2_i32_14 = arith.constant 2 : i32
      %16 = arith.muli %c2_i32_14, %4 : i32
      %c0_i32_15 = arith.constant 0 : i32
      %17 = arith.addi %16, %c0_i32_15 : i32
      %c0_16 = arith.constant 0 : index
      %18 = arith.index_cast %17 : i32 to index
      %c1 = arith.constant 1 : index
      %c0_17 = arith.constant 0 : index
      %19 = vector.load %arg1[%c0_16, %18, %c1, %c0_17] : memref<1x34x34x8xf32, #tpu.memory_space<vmem>>, vector<1x2x32x8xf32>
      %20 = vector.shape_cast %19 : vector<1x2x32x8xf32> to vector<2x32x8xf32>
      %21 = vector.shape_cast %20 : vector<2x32x8xf32> to vector<64x8xf32>
      %c1_18 = arith.constant 1 : index
      %c0_19 = arith.constant 0 : index
      %c0_20 = arith.constant 0 : index
      %22 = vector.load %arg2[%c1_18, %c0_19, %c0_20] : memref<9x8x128xf32, #tpu.memory_space<vmem>>, vector<1x8x128xf32>
      %23 = vector.shape_cast %22 : vector<1x8x128xf32> to vector<8x128xf32>
      %cst_21 = arith.constant dense<0.000000e+00> : vector<64x128xf32>
      %24 = tpu.matmul %21, %23, %cst_21 {dimension_numbers = #tpu.dot_dimension_numbers<[1], [0], [0], [1], [0, 0, 1, 1], [], []>} : vector<64x8xf32>, vector<8x128xf32>, vector<64x128xf32> -> vector<64x128xf32>
      %25 = arith.addf %15, %24 : vector<64x128xf32>
      %c2_i32_22 = arith.constant 2 : i32
      %26 = arith.muli %c2_i32_22, %4 : i32
      %c0_i32_23 = arith.constant 0 : i32
      %27 = arith.addi %26, %c0_i32_23 : i32
      %c0_24 = arith.constant 0 : index
      %28 = arith.index_cast %27 : i32 to index
      %c2 = arith.constant 2 : index
      %c0_25 = arith.constant 0 : index
      %29 = vector.load %arg1[%c0_24, %28, %c2, %c0_25] : memref<1x34x34x8xf32, #tpu.memory_space<vmem>>, vector<1x2x32x8xf32>
      %30 = vector.shape_cast %29 : vector<1x2x32x8xf32> to vector<2x32x8xf32>
      %31 = vector.shape_cast %30 : vector<2x32x8xf32> to vector<64x8xf32>
      %c2_26 = arith.constant 2 : index
      %c0_27 = arith.constant 0 : index
      %c0_28 = arith.constant 0 : index
      %32 = vector.load %arg2[%c2_26, %c0_27, %c0_28] : memref<9x8x128xf32, #tpu.memory_space<vmem>>, vector<1x8x128xf32>
      %33 = vector.shape_cast %32 : vector<1x8x128xf32> to vector<8x128xf32>
      %cst_29 = arith.constant dense<0.000000e+00> : vector<64x128xf32>
      %34 = tpu.matmul %31, %33, %cst_29 {dimension_numbers = #tpu.dot_dimension_numbers<[1], [0], [0], [1], [0, 0, 1, 1], [], []>} : vector<64x8xf32>, vector<8x128xf32>, vector<64x128xf32> -> vector<64x128xf32>
      %35 = arith.addf %25, %34 : vector<64x128xf32>
      %c2_i32_30 = arith.constant 2 : i32
      %36 = arith.muli %c2_i32_30, %4 : i32
      %c1_i32_31 = arith.constant 1 : i32
      %37 = arith.addi %36, %c1_i32_31 : i32
      %c0_32 = arith.constant 0 : index
      %38 = arith.index_cast %37 : i32 to index
      %c0_33 = arith.constant 0 : index
      %c0_34 = arith.constant 0 : index
      %39 = vector.load %arg1[%c0_32, %38, %c0_33, %c0_34] : memref<1x34x34x8xf32, #tpu.memory_space<vmem>>, vector<1x2x32x8xf32>
      %40 = vector.shape_cast %39 : vector<1x2x32x8xf32> to vector<2x32x8xf32>
      %41 = vector.shape_cast %40 : vector<2x32x8xf32> to vector<64x8xf32>
      %c3 = arith.constant 3 : index
      %c0_35 = arith.constant 0 : index
      %c0_36 = arith.constant 0 : index
      %42 = vector.load %arg2[%c3, %c0_35, %c0_36] : memref<9x8x128xf32, #tpu.memory_space<vmem>>, vector<1x8x128xf32>
      %43 = vector.shape_cast %42 : vector<1x8x128xf32> to vector<8x128xf32>
      %cst_37 = arith.constant dense<0.000000e+00> : vector<64x128xf32>
      %44 = tpu.matmul %41, %43, %cst_37 {dimension_numbers = #tpu.dot_dimension_numbers<[1], [0], [0], [1], [0, 0, 1, 1], [], []>} : vector<64x8xf32>, vector<8x128xf32>, vector<64x128xf32> -> vector<64x128xf32>
      %45 = arith.addf %35, %44 : vector<64x128xf32>
      %c2_i32_38 = arith.constant 2 : i32
      %46 = arith.muli %c2_i32_38, %4 : i32
      %c1_i32_39 = arith.constant 1 : i32
      %47 = arith.addi %46, %c1_i32_39 : i32
      %c0_40 = arith.constant 0 : index
      %48 = arith.index_cast %47 : i32 to index
      %c1_41 = arith.constant 1 : index
      %c0_42 = arith.constant 0 : index
      %49 = vector.load %arg1[%c0_40, %48, %c1_41, %c0_42] : memref<1x34x34x8xf32, #tpu.memory_space<vmem>>, vector<1x2x32x8xf32>
      %50 = vector.shape_cast %49 : vector<1x2x32x8xf32> to vector<2x32x8xf32>
      %51 = vector.shape_cast %50 : vector<2x32x8xf32> to vector<64x8xf32>
      %c4 = arith.constant 4 : index
      %c0_43 = arith.constant 0 : index
      %c0_44 = arith.constant 0 : index
      %52 = vector.load %arg2[%c4, %c0_43, %c0_44] : memref<9x8x128xf32, #tpu.memory_space<vmem>>, vector<1x8x128xf32>
      %53 = vector.shape_cast %52 : vector<1x8x128xf32> to vector<8x128xf32>
      %cst_45 = arith.constant dense<0.000000e+00> : vector<64x128xf32>
      %54 = tpu.matmul %51, %53, %cst_45 {dimension_numbers = #tpu.dot_dimension_numbers<[1], [0], [0], [1], [0, 0, 1, 1], [], []>} : vector<64x8xf32>, vector<8x128xf32>, vector<64x128xf32> -> vector<64x128xf32>
      %55 = arith.addf %45, %54 : vector<64x128xf32>
      %c2_i32_46 = arith.constant 2 : i32
      %56 = arith.muli %c2_i32_46, %4 : i32
      %c1_i32_47 = arith.constant 1 : i32
      %57 = arith.addi %56, %c1_i32_47 : i32
      %c0_48 = arith.constant 0 : index
      %58 = arith.index_cast %57 : i32 to index
      %c2_49 = arith.constant 2 : index
      %c0_50 = arith.constant 0 : index
      %59 = vector.load %arg1[%c0_48, %58, %c2_49, %c0_50] : memref<1x34x34x8xf32, #tpu.memory_space<vmem>>, vector<1x2x32x8xf32>
      %60 = vector.shape_cast %59 : vector<1x2x32x8xf32> to vector<2x32x8xf32>
      %61 = vector.shape_cast %60 : vector<2x32x8xf32> to vector<64x8xf32>
      %c5 = arith.constant 5 : index
      %c0_51 = arith.constant 0 : index
      %c0_52 = arith.constant 0 : index
      %62 = vector.load %arg2[%c5, %c0_51, %c0_52] : memref<9x8x128xf32, #tpu.memory_space<vmem>>, vector<1x8x128xf32>
      %63 = vector.shape_cast %62 : vector<1x8x128xf32> to vector<8x128xf32>
      %cst_53 = arith.constant dense<0.000000e+00> : vector<64x128xf32>
      %64 = tpu.matmul %61, %63, %cst_53 {dimension_numbers = #tpu.dot_dimension_numbers<[1], [0], [0], [1], [0, 0, 1, 1], [], []>} : vector<64x8xf32>, vector<8x128xf32>, vector<64x128xf32> -> vector<64x128xf32>
      %65 = arith.addf %55, %64 : vector<64x128xf32>
      %c2_i32_54 = arith.constant 2 : i32
      %66 = arith.muli %c2_i32_54, %4 : i32
      %c2_i32_55 = arith.constant 2 : i32
      %67 = arith.addi %66, %c2_i32_55 : i32
      %c0_56 = arith.constant 0 : index
      %68 = arith.index_cast %67 : i32 to index
      %c0_57 = arith.constant 0 : index
      %c0_58 = arith.constant 0 : index
      %69 = vector.load %arg1[%c0_56, %68, %c0_57, %c0_58] : memref<1x34x34x8xf32, #tpu.memory_space<vmem>>, vector<1x2x32x8xf32>
      %70 = vector.shape_cast %69 : vector<1x2x32x8xf32> to vector<2x32x8xf32>
      %71 = vector.shape_cast %70 : vector<2x32x8xf32> to vector<64x8xf32>
      %c6 = arith.constant 6 : index
      %c0_59 = arith.constant 0 : index
      %c0_60 = arith.constant 0 : index
      %72 = vector.load %arg2[%c6, %c0_59, %c0_60] : memref<9x8x128xf32, #tpu.memory_space<vmem>>, vector<1x8x128xf32>
      %73 = vector.shape_cast %72 : vector<1x8x128xf32> to vector<8x128xf32>
      %cst_61 = arith.constant dense<0.000000e+00> : vector<64x128xf32>
      %74 = tpu.matmul %71, %73, %cst_61 {dimension_numbers = #tpu.dot_dimension_numbers<[1], [0], [0], [1], [0, 0, 1, 1], [], []>} : vector<64x8xf32>, vector<8x128xf32>, vector<64x128xf32> -> vector<64x128xf32>
      %75 = arith.addf %65, %74 : vector<64x128xf32>
      %c2_i32_62 = arith.constant 2 : i32
      %76 = arith.muli %c2_i32_62, %4 : i32
      %c2_i32_63 = arith.constant 2 : i32
      %77 = arith.addi %76, %c2_i32_63 : i32
      %c0_64 = arith.constant 0 : index
      %78 = arith.index_cast %77 : i32 to index
      %c1_65 = arith.constant 1 : index
      %c0_66 = arith.constant 0 : index
      %79 = vector.load %arg1[%c0_64, %78, %c1_65, %c0_66] : memref<1x34x34x8xf32, #tpu.memory_space<vmem>>, vector<1x2x32x8xf32>
      %80 = vector.shape_cast %79 : vector<1x2x32x8xf32> to vector<2x32x8xf32>
      %81 = vector.shape_cast %80 : vector<2x32x8xf32> to vector<64x8xf32>
      %c7 = arith.constant 7 : index
      %c0_67 = arith.constant 0 : index
      %c0_68 = arith.constant 0 : index
      %82 = vector.load %arg2[%c7, %c0_67, %c0_68] : memref<9x8x128xf32, #tpu.memory_space<vmem>>, vector<1x8x128xf32>
      %83 = vector.shape_cast %82 : vector<1x8x128xf32> to vector<8x128xf32>
      %cst_69 = arith.constant dense<0.000000e+00> : vector<64x128xf32>
      %84 = tpu.matmul %81, %83, %cst_69 {dimension_numbers = #tpu.dot_dimension_numbers<[1], [0], [0], [1], [0, 0, 1, 1], [], []>} : vector<64x8xf32>, vector<8x128xf32>, vector<64x128xf32> -> vector<64x128xf32>
      %85 = arith.addf %75, %84 : vector<64x128xf32>
      %c2_i32_70 = arith.constant 2 : i32
      %86 = arith.muli %c2_i32_70, %4 : i32
      %c2_i32_71 = arith.constant 2 : i32
      %87 = arith.addi %86, %c2_i32_71 : i32
      %c0_72 = arith.constant 0 : index
      %88 = arith.index_cast %87 : i32 to index
      %c2_73 = arith.constant 2 : index
      %c0_74 = arith.constant 0 : index
      %89 = vector.load %arg1[%c0_72, %88, %c2_73, %c0_74] : memref<1x34x34x8xf32, #tpu.memory_space<vmem>>, vector<1x2x32x8xf32>
      %90 = vector.shape_cast %89 : vector<1x2x32x8xf32> to vector<2x32x8xf32>
      %91 = vector.shape_cast %90 : vector<2x32x8xf32> to vector<64x8xf32>
      %c8 = arith.constant 8 : index
      %c0_75 = arith.constant 0 : index
      %c0_76 = arith.constant 0 : index
      %92 = vector.load %arg2[%c8, %c0_75, %c0_76] : memref<9x8x128xf32, #tpu.memory_space<vmem>>, vector<1x8x128xf32>
      %93 = vector.shape_cast %92 : vector<1x8x128xf32> to vector<8x128xf32>
      %cst_77 = arith.constant dense<0.000000e+00> : vector<64x128xf32>
      %94 = tpu.matmul %91, %93, %cst_77 {dimension_numbers = #tpu.dot_dimension_numbers<[1], [0], [0], [1], [0, 0, 1, 1], [], []>} : vector<64x8xf32>, vector<8x128xf32>, vector<64x128xf32> -> vector<64x128xf32>
      %95 = arith.addf %85, %94 : vector<64x128xf32>
      %96 = vector.broadcast %0 : vector<1x128xf32> to vector<64x128xf32>
      %97 = arith.mulf %95, %96 : vector<64x128xf32>
      %98 = vector.broadcast %1 : vector<1x128xf32> to vector<64x128xf32>
      %99 = arith.addf %97, %98 : vector<64x128xf32>
      %cst_78 = arith.constant 0.000000e+00 : f32
      %100 = vector.broadcast %cst_78 : f32 to vector<64x128xf32>
      %101 = arith.maximumf %99, %100 : vector<64x128xf32>
      %102 = vector.extract_strided_slice %101 {offsets = [0, 0], sizes = [32, 128], strides = [1, 1]} : vector<64x128xf32> to vector<32x128xf32>
      %103 = vector.extract_strided_slice %101 {offsets = [32, 0], sizes = [32, 128], strides = [1, 1]} : vector<64x128xf32> to vector<32x128xf32>
      %104 = arith.maximumf %102, %103 : vector<32x128xf32>
      %105 = vector.shape_cast %104 : vector<32x128xf32> to vector<16x2x128xf32>
      %cst_79 = arith.constant dense<0xFF800000> : vector<16x128xf32>
      %106 = vector.multi_reduction <maximumf>, %105, %cst_79 [1] : vector<16x2x128xf32> to vector<16x128xf32>
      %107 = vector.shape_cast %106 : vector<16x128xf32> to vector<1x16x128xf32>
      %c0_80 = arith.constant 0 : index
      %108 = arith.index_cast %4 : i32 to index
      %c0_81 = arith.constant 0 : index
      %c0_82 = arith.constant 0 : index
      %109 = vector.load %arg5[%c0_80, %108, %c0_81, %c0_82] : memref<1x16x16x128xf32, #tpu.memory_space<vmem>>, vector<1x1x16x128xf32>
      %110 = vector.shape_cast %109 : vector<1x1x16x128xf32> to vector<1x16x128xf32>
      %111 = vector.shape_cast %107 : vector<1x16x128xf32> to vector<1x1x16x128xf32>
      tpu.vector_store %arg5[%c0_80, %108, %c0_81, %c0_82], %111 {strides = array<i32>} : memref<1x16x16x128xf32, #tpu.memory_space<vmem>>, vector<1x1x16x128xf32>,
    }
    %c16_i32_3 = arith.constant 16 : i32
    return
  }
  func.func @transform_0(%arg0: i32) -> (i32, i32, i32, i32) {
    %c0_i32 = arith.constant 0 : i32
    %c0_i32_0 = arith.constant 0 : i32
    %c0_i32_1 = arith.constant 0 : i32
    %c0_i32_2 = arith.constant 0 : i32
    return %arg0, %c0_i32, %c0_i32_0, %c0_i32_1 : i32, i32, i32, i32
  }
  func.func @transform_1(%arg0: i32) -> (i32, i32, i32) {
    %c0_i32 = arith.constant 0 : i32
    %c0_i32_0 = arith.constant 0 : i32
    %c0_i32_1 = arith.constant 0 : i32
    %c0_i32_2 = arith.constant 0 : i32
    return %c0_i32, %c0_i32_0, %c0_i32_1 : i32, i32, i32
  }
  func.func @transform_2(%arg0: i32) -> (i32, i32) {
    %c0_i32 = arith.constant 0 : i32
    %c0_i32_0 = arith.constant 0 : i32
    %c0_i32_1 = arith.constant 0 : i32
    return %c0_i32, %c0_i32_0 : i32, i32
  }
  func.func @transform_3(%arg0: i32) -> (i32, i32) {
    %c0_i32 = arith.constant 0 : i32
    %c0_i32_0 = arith.constant 0 : i32
    %c0_i32_1 = arith.constant 0 : i32
    return %c0_i32, %c0_i32_0 : i32, i32
  }
  func.func @transform_4(%arg0: i32) -> (i32, i32, i32, i32) {
    %c0_i32 = arith.constant 0 : i32
    %c0_i32_0 = arith.constant 0 : i32
    %c0_i32_1 = arith.constant 0 : i32
    %c0_i32_2 = arith.constant 0 : i32
    return %arg0, %c0_i32, %c0_i32_0, %c0_i32_1 : i32, i32, i32, i32
  }
}

module attributes {stable_mosaic.version = 11 : i64} {
  func.func @_conv_bn_relu_pool_kernel(%arg0: i32, %arg1: memref<1x18x18x128xf32, #tpu.memory_space<vmem>>, %arg2: memref<9x128x128xf32, #tpu.memory_space<vmem>>, %arg3: memref<1x128xf32, #tpu.memory_space<vmem>>, %arg4: memref<1x128xf32, #tpu.memory_space<vmem>>, %arg5: memref<1x8x8x128xf32, #tpu.memory_space<vmem>>) attributes {dimension_semantics = [#tpu.dimension_semantics<parallel>], iteration_bounds = array<i64: 2>, scalar_prefetch = 0 : i64, scratch_operands = 0 : i64, tpu.core_type = #tpu.core_type<tc>, window_params = [{transform_indices = @transform_0, window_bounds = array<i64: 1, 18, 18, 128>}, {pipeline_mode = #tpu.pipeline_mode<synchronous>, transform_indices = @transform_1, window_bounds = array<i64: 9, 128, 128>}, {pipeline_mode = #tpu.pipeline_mode<synchronous>, transform_indices = @transform_2, window_bounds = array<i64: 1, 128>}, {pipeline_mode = #tpu.pipeline_mode<synchronous>, transform_indices = @transform_3, window_bounds = array<i64: 1, 128>}, {transform_indices = @transform_4, window_bounds = array<i64: 1, 8, 8, 128>}]} {
    %c0 = arith.constant 0 : index
    %c0_0 = arith.constant 0 : index
    %0 = vector.load %arg3[%c0, %c0_0] : memref<1x128xf32, #tpu.memory_space<vmem>>, vector<1x128xf32>
    %c0_1 = arith.constant 0 : index
    %c0_2 = arith.constant 0 : index
    %1 = vector.load %arg4[%c0_1, %c0_2] : memref<1x128xf32, #tpu.memory_space<vmem>>, vector<1x128xf32>
    %c0_i32 = arith.constant 0 : i32
    %c8_i32 = arith.constant 8 : i32
    %2 = arith.addi %c0_i32, %c8_i32 : i32
    %c1_i32 = arith.constant 1 : i32
    scf.for %arg6 = %c0_i32 to %2 step %c1_i32  : i32 {
      %c1_i32_4 = arith.constant 1 : i32
      %3 = arith.muli %arg6, %c1_i32_4 : i32
      %c0_i32_5 = arith.constant 0 : i32
      %4 = arith.addi %c0_i32_5, %3 : i32
      %cst = arith.constant 0.000000e+00 : f32
      %5 = vector.broadcast %cst : f32 to vector<32x128xf32>
      %c2_i32 = arith.constant 2 : i32
      %6 = arith.muli %c2_i32, %4 : i32
      %c0_i32_6 = arith.constant 0 : i32
      %7 = arith.addi %6, %c0_i32_6 : i32
      %c0_7 = arith.constant 0 : index
      %8 = arith.index_cast %7 : i32 to index
      %c0_8 = arith.constant 0 : index
      %c0_9 = arith.constant 0 : index
      %9 = vector.load %arg1[%c0_7, %8, %c0_8, %c0_9] : memref<1x18x18x128xf32, #tpu.memory_space<vmem>>, vector<1x2x16x128xf32>
      %10 = vector.shape_cast %9 : vector<1x2x16x128xf32> to vector<2x16x128xf32>
      %11 = vector.shape_cast %10 : vector<2x16x128xf32> to vector<32x128xf32>
      %c0_10 = arith.constant 0 : index
      %c0_11 = arith.constant 0 : index
      %c0_12 = arith.constant 0 : index
      %12 = vector.load %arg2[%c0_10, %c0_11, %c0_12] : memref<9x128x128xf32, #tpu.memory_space<vmem>>, vector<1x128x128xf32>
      %13 = vector.shape_cast %12 : vector<1x128x128xf32> to vector<128x128xf32>
      %cst_13 = arith.constant dense<0.000000e+00> : vector<32x128xf32>
      %14 = tpu.matmul %11, %13, %cst_13 {dimension_numbers = #tpu.dot_dimension_numbers<[1], [0], [0], [1], [0, 0, 1, 1], [], []>} : vector<32x128xf32>, vector<128x128xf32>, vector<32x128xf32> -> vector<32x128xf32>
      %15 = arith.addf %5, %14 : vector<32x128xf32>
      %c2_i32_14 = arith.constant 2 : i32
      %16 = arith.muli %c2_i32_14, %4 : i32
      %c0_i32_15 = arith.constant 0 : i32
      %17 = arith.addi %16, %c0_i32_15 : i32
      %c0_16 = arith.constant 0 : index
      %18 = arith.index_cast %17 : i32 to index
      %c1 = arith.constant 1 : index
      %c0_17 = arith.constant 0 : index
      %19 = vector.load %arg1[%c0_16, %18, %c1, %c0_17] : memref<1x18x18x128xf32, #tpu.memory_space<vmem>>, vector<1x2x16x128xf32>
      %20 = vector.shape_cast %19 : vector<1x2x16x128xf32> to vector<2x16x128xf32>
      %21 = vector.shape_cast %20 : vector<2x16x128xf32> to vector<32x128xf32>
      %c1_18 = arith.constant 1 : index
      %c0_19 = arith.constant 0 : index
      %c0_20 = arith.constant 0 : index
      %22 = vector.load %arg2[%c1_18, %c0_19, %c0_20] : memref<9x128x128xf32, #tpu.memory_space<vmem>>, vector<1x128x128xf32>
      %23 = vector.shape_cast %22 : vector<1x128x128xf32> to vector<128x128xf32>
      %cst_21 = arith.constant dense<0.000000e+00> : vector<32x128xf32>
      %24 = tpu.matmul %21, %23, %cst_21 {dimension_numbers = #tpu.dot_dimension_numbers<[1], [0], [0], [1], [0, 0, 1, 1], [], []>} : vector<32x128xf32>, vector<128x128xf32>, vector<32x128xf32> -> vector<32x128xf32>
      %25 = arith.addf %15, %24 : vector<32x128xf32>
      %c2_i32_22 = arith.constant 2 : i32
      %26 = arith.muli %c2_i32_22, %4 : i32
      %c0_i32_23 = arith.constant 0 : i32
      %27 = arith.addi %26, %c0_i32_23 : i32
      %c0_24 = arith.constant 0 : index
      %28 = arith.index_cast %27 : i32 to index
      %c2 = arith.constant 2 : index
      %c0_25 = arith.constant 0 : index
      %29 = vector.load %arg1[%c0_24, %28, %c2, %c0_25] : memref<1x18x18x128xf32, #tpu.memory_space<vmem>>, vector<1x2x16x128xf32>
      %30 = vector.shape_cast %29 : vector<1x2x16x128xf32> to vector<2x16x128xf32>
      %31 = vector.shape_cast %30 : vector<2x16x128xf32> to vector<32x128xf32>
      %c2_26 = arith.constant 2 : index
      %c0_27 = arith.constant 0 : index
      %c0_28 = arith.constant 0 : index
      %32 = vector.load %arg2[%c2_26, %c0_27, %c0_28] : memref<9x128x128xf32, #tpu.memory_space<vmem>>, vector<1x128x128xf32>
      %33 = vector.shape_cast %32 : vector<1x128x128xf32> to vector<128x128xf32>
      %cst_29 = arith.constant dense<0.000000e+00> : vector<32x128xf32>
      %34 = tpu.matmul %31, %33, %cst_29 {dimension_numbers = #tpu.dot_dimension_numbers<[1], [0], [0], [1], [0, 0, 1, 1], [], []>} : vector<32x128xf32>, vector<128x128xf32>, vector<32x128xf32> -> vector<32x128xf32>
      %35 = arith.addf %25, %34 : vector<32x128xf32>
      %c2_i32_30 = arith.constant 2 : i32
      %36 = arith.muli %c2_i32_30, %4 : i32
      %c1_i32_31 = arith.constant 1 : i32
      %37 = arith.addi %36, %c1_i32_31 : i32
      %c0_32 = arith.constant 0 : index
      %38 = arith.index_cast %37 : i32 to index
      %c0_33 = arith.constant 0 : index
      %c0_34 = arith.constant 0 : index
      %39 = vector.load %arg1[%c0_32, %38, %c0_33, %c0_34] : memref<1x18x18x128xf32, #tpu.memory_space<vmem>>, vector<1x2x16x128xf32>
      %40 = vector.shape_cast %39 : vector<1x2x16x128xf32> to vector<2x16x128xf32>
      %41 = vector.shape_cast %40 : vector<2x16x128xf32> to vector<32x128xf32>
      %c3 = arith.constant 3 : index
      %c0_35 = arith.constant 0 : index
      %c0_36 = arith.constant 0 : index
      %42 = vector.load %arg2[%c3, %c0_35, %c0_36] : memref<9x128x128xf32, #tpu.memory_space<vmem>>, vector<1x128x128xf32>
      %43 = vector.shape_cast %42 : vector<1x128x128xf32> to vector<128x128xf32>
      %cst_37 = arith.constant dense<0.000000e+00> : vector<32x128xf32>
      %44 = tpu.matmul %41, %43, %cst_37 {dimension_numbers = #tpu.dot_dimension_numbers<[1], [0], [0], [1], [0, 0, 1, 1], [], []>} : vector<32x128xf32>, vector<128x128xf32>, vector<32x128xf32> -> vector<32x128xf32>
      %45 = arith.addf %35, %44 : vector<32x128xf32>
      %c2_i32_38 = arith.constant 2 : i32
      %46 = arith.muli %c2_i32_38, %4 : i32
      %c1_i32_39 = arith.constant 1 : i32
      %47 = arith.addi %46, %c1_i32_39 : i32
      %c0_40 = arith.constant 0 : index
      %48 = arith.index_cast %47 : i32 to index
      %c1_41 = arith.constant 1 : index
      %c0_42 = arith.constant 0 : index
      %49 = vector.load %arg1[%c0_40, %48, %c1_41, %c0_42] : memref<1x18x18x128xf32, #tpu.memory_space<vmem>>, vector<1x2x16x128xf32>
      %50 = vector.shape_cast %49 : vector<1x2x16x128xf32> to vector<2x16x128xf32>
      %51 = vector.shape_cast %50 : vector<2x16x128xf32> to vector<32x128xf32>
      %c4 = arith.constant 4 : index
      %c0_43 = arith.constant 0 : index
      %c0_44 = arith.constant 0 : index
      %52 = vector.load %arg2[%c4, %c0_43, %c0_44] : memref<9x128x128xf32, #tpu.memory_space<vmem>>, vector<1x128x128xf32>
      %53 = vector.shape_cast %52 : vector<1x128x128xf32> to vector<128x128xf32>
      %cst_45 = arith.constant dense<0.000000e+00> : vector<32x128xf32>
      %54 = tpu.matmul %51, %53, %cst_45 {dimension_numbers = #tpu.dot_dimension_numbers<[1], [0], [0], [1], [0, 0, 1, 1], [], []>} : vector<32x128xf32>, vector<128x128xf32>, vector<32x128xf32> -> vector<32x128xf32>
      %55 = arith.addf %45, %54 : vector<32x128xf32>
      %c2_i32_46 = arith.constant 2 : i32
      %56 = arith.muli %c2_i32_46, %4 : i32
      %c1_i32_47 = arith.constant 1 : i32
      %57 = arith.addi %56, %c1_i32_47 : i32
      %c0_48 = arith.constant 0 : index
      %58 = arith.index_cast %57 : i32 to index
      %c2_49 = arith.constant 2 : index
      %c0_50 = arith.constant 0 : index
      %59 = vector.load %arg1[%c0_48, %58, %c2_49, %c0_50] : memref<1x18x18x128xf32, #tpu.memory_space<vmem>>, vector<1x2x16x128xf32>
      %60 = vector.shape_cast %59 : vector<1x2x16x128xf32> to vector<2x16x128xf32>
      %61 = vector.shape_cast %60 : vector<2x16x128xf32> to vector<32x128xf32>
      %c5 = arith.constant 5 : index
      %c0_51 = arith.constant 0 : index
      %c0_52 = arith.constant 0 : index
      %62 = vector.load %arg2[%c5, %c0_51, %c0_52] : memref<9x128x128xf32, #tpu.memory_space<vmem>>, vector<1x128x128xf32>
      %63 = vector.shape_cast %62 : vector<1x128x128xf32> to vector<128x128xf32>
      %cst_53 = arith.constant dense<0.000000e+00> : vector<32x128xf32>
      %64 = tpu.matmul %61, %63, %cst_53 {dimension_numbers = #tpu.dot_dimension_numbers<[1], [0], [0], [1], [0, 0, 1, 1], [], []>} : vector<32x128xf32>, vector<128x128xf32>, vector<32x128xf32> -> vector<32x128xf32>
      %65 = arith.addf %55, %64 : vector<32x128xf32>
      %c2_i32_54 = arith.constant 2 : i32
      %66 = arith.muli %c2_i32_54, %4 : i32
      %c2_i32_55 = arith.constant 2 : i32
      %67 = arith.addi %66, %c2_i32_55 : i32
      %c0_56 = arith.constant 0 : index
      %68 = arith.index_cast %67 : i32 to index
      %c0_57 = arith.constant 0 : index
      %c0_58 = arith.constant 0 : index
      %69 = vector.load %arg1[%c0_56, %68, %c0_57, %c0_58] : memref<1x18x18x128xf32, #tpu.memory_space<vmem>>, vector<1x2x16x128xf32>
      %70 = vector.shape_cast %69 : vector<1x2x16x128xf32> to vector<2x16x128xf32>
      %71 = vector.shape_cast %70 : vector<2x16x128xf32> to vector<32x128xf32>
      %c6 = arith.constant 6 : index
      %c0_59 = arith.constant 0 : index
      %c0_60 = arith.constant 0 : index
      %72 = vector.load %arg2[%c6, %c0_59, %c0_60] : memref<9x128x128xf32, #tpu.memory_space<vmem>>, vector<1x128x128xf32>
      %73 = vector.shape_cast %72 : vector<1x128x128xf32> to vector<128x128xf32>
      %cst_61 = arith.constant dense<0.000000e+00> : vector<32x128xf32>
      %74 = tpu.matmul %71, %73, %cst_61 {dimension_numbers = #tpu.dot_dimension_numbers<[1], [0], [0], [1], [0, 0, 1, 1], [], []>} : vector<32x128xf32>, vector<128x128xf32>, vector<32x128xf32> -> vector<32x128xf32>
      %75 = arith.addf %65, %74 : vector<32x128xf32>
      %c2_i32_62 = arith.constant 2 : i32
      %76 = arith.muli %c2_i32_62, %4 : i32
      %c2_i32_63 = arith.constant 2 : i32
      %77 = arith.addi %76, %c2_i32_63 : i32
      %c0_64 = arith.constant 0 : index
      %78 = arith.index_cast %77 : i32 to index
      %c1_65 = arith.constant 1 : index
      %c0_66 = arith.constant 0 : index
      %79 = vector.load %arg1[%c0_64, %78, %c1_65, %c0_66] : memref<1x18x18x128xf32, #tpu.memory_space<vmem>>, vector<1x2x16x128xf32>
      %80 = vector.shape_cast %79 : vector<1x2x16x128xf32> to vector<2x16x128xf32>
      %81 = vector.shape_cast %80 : vector<2x16x128xf32> to vector<32x128xf32>
      %c7 = arith.constant 7 : index
      %c0_67 = arith.constant 0 : index
      %c0_68 = arith.constant 0 : index
      %82 = vector.load %arg2[%c7, %c0_67, %c0_68] : memref<9x128x128xf32, #tpu.memory_space<vmem>>, vector<1x128x128xf32>
      %83 = vector.shape_cast %82 : vector<1x128x128xf32> to vector<128x128xf32>
      %cst_69 = arith.constant dense<0.000000e+00> : vector<32x128xf32>
      %84 = tpu.matmul %81, %83, %cst_69 {dimension_numbers = #tpu.dot_dimension_numbers<[1], [0], [0], [1], [0, 0, 1, 1], [], []>} : vector<32x128xf32>, vector<128x128xf32>, vector<32x128xf32> -> vector<32x128xf32>
      %85 = arith.addf %75, %84 : vector<32x128xf32>
      %c2_i32_70 = arith.constant 2 : i32
      %86 = arith.muli %c2_i32_70, %4 : i32
      %c2_i32_71 = arith.constant 2 : i32
      %87 = arith.addi %86, %c2_i32_71 : i32
      %c0_72 = arith.constant 0 : index
      %88 = arith.index_cast %87 : i32 to index
      %c2_73 = arith.constant 2 : index
      %c0_74 = arith.constant 0 : index
      %89 = vector.load %arg1[%c0_72, %88, %c2_73, %c0_74] : memref<1x18x18x128xf32, #tpu.memory_space<vmem>>, vector<1x2x16x128xf32>
      %90 = vector.shape_cast %89 : vector<1x2x16x128xf32> to vector<2x16x128xf32>
      %91 = vector.shape_cast %90 : vector<2x16x128xf32> to vector<32x128xf32>
      %c8 = arith.constant 8 : index
      %c0_75 = arith.constant 0 : index
      %c0_76 = arith.constant 0 : index
      %92 = vector.load %arg2[%c8, %c0_75, %c0_76] : memref<9x128x128xf32, #tpu.memory_space<vmem>>, vector<1x128x128xf32>
      %93 = vector.shape_cast %92 : vector<1x128x128xf32> to vector<128x128xf32>
      %cst_77 = arith.constant dense<0.000000e+00> : vector<32x128xf32>
      %94 = tpu.matmul %91, %93, %cst_77 {dimension_numbers = #tpu.dot_dimension_numbers<[1], [0], [0], [1], [0, 0, 1, 1], [], []>} : vector<32x128xf32>, vector<128x128xf32>, vector<32x128xf32> -> vector<32x128xf32>
      %95 = arith.addf %85, %94 : vector<32x128xf32>
      %96 = vector.broadcast %0 : vector<1x128xf32> to vector<32x128xf32>
      %97 = arith.mulf %95, %96 : vector<32x128xf32>
      %98 = vector.broadcast %1 : vector<1x128xf32> to vector<32x128xf32>
      %99 = arith.addf %97, %98 : vector<32x128xf32>
      %cst_78 = arith.constant 0.000000e+00 : f32
      %100 = vector.broadcast %cst_78 : f32 to vector<32x128xf32>
      %101 = arith.maximumf %99, %100 : vector<32x128xf32>
      %102 = vector.extract_strided_slice %101 {offsets = [0, 0], sizes = [16, 128], strides = [1, 1]} : vector<32x128xf32> to vector<16x128xf32>
      %103 = vector.extract_strided_slice %101 {offsets = [16, 0], sizes = [16, 128], strides = [1, 1]} : vector<32x128xf32> to vector<16x128xf32>
      %104 = arith.maximumf %102, %103 : vector<16x128xf32>
      %105 = vector.shape_cast %104 : vector<16x128xf32> to vector<8x2x128xf32>
      %cst_79 = arith.constant dense<0xFF800000> : vector<8x128xf32>
      %106 = vector.multi_reduction <maximumf>, %105, %cst_79 [1] : vector<8x2x128xf32> to vector<8x128xf32>
      %107 = vector.shape_cast %106 : vector<8x128xf32> to vector<1x8x128xf32>
      %c0_80 = arith.constant 0 : index
      %108 = arith.index_cast %4 : i32 to index
      %c0_81 = arith.constant 0 : index
      %c0_82 = arith.constant 0 : index
      %109 = vector.load %arg5[%c0_80, %108, %c0_81, %c0_82] : memref<1x8x8x128xf32, #tpu.memory_space<vmem>>, vector<1x1x8x128xf32>
      %110 = vector.shape_cast %109 : vector<1x1x8x128xf32> to vector<1x8x128xf32>
      %111 = vector.shape_cast %107 : vector<1x8x128xf32> to vector<1x1x8x128xf32>
      tpu.vector_store %arg5[%c0_80, %108, %c0_81, %c0_82], %111 {strides = array<i32>} : memref<1x8x8x128xf32, #tpu.memory_space<vmem>>, vector<1x1x8x128xf32>,
    }
    %c8_i32_3 = arith.constant 8 : i32
    return
  }
  func.func @transform_0(%arg0: i32) -> (i32, i32, i32, i32) {
    %c0_i32 = arith.constant 0 : i32
    %c0_i32_0 = arith.constant 0 : i32
    %c0_i32_1 = arith.constant 0 : i32
    %c0_i32_2 = arith.constant 0 : i32
    return %arg0, %c0_i32, %c0_i32_0, %c0_i32_1 : i32, i32, i32, i32
  }
  func.func @transform_1(%arg0: i32) -> (i32, i32, i32) {
    %c0_i32 = arith.constant 0 : i32
    %c0_i32_0 = arith.constant 0 : i32
    %c0_i32_1 = arith.constant 0 : i32
    %c0_i32_2 = arith.constant 0 : i32
    return %c0_i32, %c0_i32_0, %c0_i32_1 : i32, i32, i32
  }
  func.func @transform_2(%arg0: i32) -> (i32, i32) {
    %c0_i32 = arith.constant 0 : i32
    %c0_i32_0 = arith.constant 0 : i32
    %c0_i32_1 = arith.constant 0 : i32
    return %c0_i32, %c0_i32_0 : i32, i32
  }
  func.func @transform_3(%arg0: i32) -> (i32, i32) {
    %c0_i32 = arith.constant 0 : i32
    %c0_i32_0 = arith.constant 0 : i32
    %c0_i32_1 = arith.constant 0 : i32
    return %c0_i32, %c0_i32_0 : i32, i32
  }
  func.func @transform_4(%arg0: i32) -> (i32, i32, i32, i32) {
    %c0_i32 = arith.constant 0 : i32
    %c0_i32_0 = arith.constant 0 : i32
    %c0_i32_1 = arith.constant 0 : i32
    %c0_i32_2 = arith.constant 0 : i32
    return %arg0, %c0_i32, %c0_i32_0, %c0_i32_1 : i32, i32, i32, i32
  }
}

module attributes {stable_mosaic.version = 11 : i64} {
  func.func @_fc_kernel(%arg0: i32, %arg1: memref<2x1024xf32, #tpu.memory_space<vmem>>, %arg2: memref<1024x128xf32, #tpu.memory_space<vmem>>, %arg3: memref<1x128xf32, #tpu.memory_space<vmem>>, %arg4: memref<2x128xf32, #tpu.memory_space<vmem>>) attributes {dimension_semantics = [#tpu.dimension_semantics<parallel>], iteration_bounds = array<i64: 1>, scalar_prefetch = 0 : i64, scratch_operands = 0 : i64, tpu.core_type = #tpu.core_type<tc>, window_params = [{transform_indices = @transform_0, window_bounds = array<i64: 2, 1024>}, {pipeline_mode = #tpu.pipeline_mode<synchronous>, transform_indices = @transform_1, window_bounds = array<i64: 1024, 128>}, {pipeline_mode = #tpu.pipeline_mode<synchronous>, transform_indices = @transform_2, window_bounds = array<i64: 1, 128>}, {transform_indices = @transform_3, window_bounds = array<i64: 2, 128>}]} {
    %c0 = arith.constant 0 : index
    %c0_0 = arith.constant 0 : index
    %0 = vector.load %arg1[%c0, %c0_0] : memref<2x1024xf32, #tpu.memory_space<vmem>>, vector<2x1024xf32>
    %c0_1 = arith.constant 0 : index
    %c0_2 = arith.constant 0 : index
    %1 = vector.load %arg2[%c0_1, %c0_2] : memref<1024x128xf32, #tpu.memory_space<vmem>>, vector<1024x128xf32>
    %cst = arith.constant dense<0.000000e+00> : vector<2x128xf32>
    %2 = tpu.matmul %0, %1, %cst {dimension_numbers = #tpu.dot_dimension_numbers<[1], [0], [0], [1], [0, 0, 1, 1], [], []>} : vector<2x1024xf32>, vector<1024x128xf32>, vector<2x128xf32> -> vector<2x128xf32>
    %c0_3 = arith.constant 0 : index
    %c0_4 = arith.constant 0 : index
    %3 = vector.load %arg3[%c0_3, %c0_4] : memref<1x128xf32, #tpu.memory_space<vmem>>, vector<1x128xf32>
    %4 = vector.broadcast %3 : vector<1x128xf32> to vector<2x128xf32>
    %5 = arith.addf %2, %4 : vector<2x128xf32>
    %c0_5 = arith.constant 0 : index
    %c0_6 = arith.constant 0 : index
    %6 = vector.load %arg4[%c0_5, %c0_6] : memref<2x128xf32, #tpu.memory_space<vmem>>, vector<2x128xf32>
    tpu.vector_store %arg4[%c0_5, %c0_6], %5 {strides = array<i32>} : memref<2x128xf32, #tpu.memory_space<vmem>>, vector<2x128xf32>,
    return
  }
  func.func @transform_0(%arg0: i32) -> (i32, i32) {
    %c0_i32 = arith.constant 0 : i32
    %c0_i32_0 = arith.constant 0 : i32
    return %arg0, %c0_i32 : i32, i32
  }
  func.func @transform_1(%arg0: i32) -> (i32, i32) {
    %c0_i32 = arith.constant 0 : i32
    %c0_i32_0 = arith.constant 0 : i32
    %c0_i32_1 = arith.constant 0 : i32
    return %c0_i32, %c0_i32_0 : i32, i32
  }
  func.func @transform_2(%arg0: i32) -> (i32, i32) {
    %c0_i32 = arith.constant 0 : i32
    %c0_i32_0 = arith.constant 0 : i32
    %c0_i32_1 = arith.constant 0 : i32
    return %c0_i32, %c0_i32_0 : i32, i32
  }
  func.func @transform_3(%arg0: i32) -> (i32, i32) {
    %c0_i32 = arith.constant 0 : i32
    %c0_i32_0 = arith.constant 0 : i32
    return %arg0, %c0_i32 : i32, i32
  }
}

</mosaic_0001>

<bundles_post_ra>
// kernel: convnet_forward.4
= control target key start
LH: loop header
LB: loop body
LE: loop exit
PB: predicated region body
PF: predicated region fallthrough
CT: control target
= control target key end

     0   :  { %s2207_s15 = smov 0   ;;  %s2764_s0 = inlined_call_operand.vmem [shape: f32[2,18,18,128], index: 0, kind: input, shape index: {}]   ;;  %s2765_s1 = inlined_call_operand.vmem [shape: f32[9,128,128], index: 1, kind: input, shape index: {}]   ;;  %s2766_s2 = inlined_call_operand.vmem [shape: f32[1,128], index: 2, kind: input, shape index: {}]   ;;  %s2767_s3 = inlined_call_operand.vmem [shape: f32[1,128], index: 3, kind: input, shape index: {}]   ;;  %s2768_s4 = inlined_call_operand.vmem [shape: f32[2,8,8,128], index: 4, kind: output, shape index: {}]  }
   0x1 LB: > { %s1421_s16 = sadd.s32 4294967295, %s2175_s15   ;;  %p1425_p0 = scmp.ge.s32.totalorder %s2175_s15, 1  ;;  %s2175_s15 = sphi %s2207_s15, %s14_s15  }
   0x2   : > { %p162_p1 = scmp.lt.s32.totalorder %s2175_s15, 3 }
   0x4   : > { %p163_p2 = pnand %p1425_p0, %p162_p1 }
   0x5   : > { %p188_p3 = scmp.lt.s32.totalorder (!%p163_p2), %s1421_s16, 1  ;;  %s2235_s29 = smov (!%p163_p2), 0  }
   0x6   : > { %166 = sbr.rel (%p163_p2) target bundleno = 425 (0x1a9), region = 36 }
   0xb   : > { %v2218_v0 = vld [vmem:[%s2766_s2] ss:$0 sm:$0xff]  ;;  %s2770_s16 = smov (!%p188_p3, %s1421_s16), 1 }
   0xc   : > { %v2223_v1 = vld [vmem:[%s2767_s3] ss:$0 sm:$0xff]  ;;  %s2147_s21 = smul.u32 432, %s2770_s16  ;;  %s1592_s22 = sshll.u32 %s2770_s16, 6 }
   0xd   : > { %s2228_s25 = scalar_lea.vmem %s2768_s4, %s1592_s22 }
   0xe   : > { %s2233_s28 = scalar_lea.vmem %s2764_s0, %s2147_s21 }
   0xf LB: >> { %v1446_v2 = vld [vmem:[%s2765_s1 + $0xf8] sm:$0xff]  ;;  %v1445_v4 = vld [vmem:[%s2765_s1 + $0xf0] sm:$0xff]  ;;  %v1444_v6 = vld [vmem:[%s2765_s1 + $0xe8] sm:$0xff]  ;;  %s1430_s12 = smul.u32 48, %s2179_s29  ;;  %vm1266_vm0 = vcmask 1041408   ;;  %vm1331_vm1 = vcmask 1041409   ;;  %s2179_s29 = sphi %s2235_s29, %s205_s29  }
  0x10   : >> { %v228_v3 = vld [vmem:[%s2765_s1 + $0x78] sm:$0xff]  ;;  %1773 = vmatprep.subr.mxu0 %v1446_v2  ;;  %v227_v5 = vld [vmem:[%s2765_s1 + $0x70] sm:$0xff]  ;;  %v226_v7 = vld [vmem:[%s2765_s1 + $0x68] sm:$0xff]  ;;  %vm1333_vm2 = vcmask 1042434   ;;  %vm1335_vm3 = vcmask 1043459   ;;  %vm1337_vm4 = vcmask 1044484  }
  0x11   : >> { %1811 = vmatprep.subr.mxu1 %v228_v3  ;;  %1774 = vmatpush3.msra.mxu0 %v1446_v2  ;;  %v1443_v8 = vld [vmem:[%s2765_s1 + $0xe0] sm:$0xff]  ;;  %v1442_v10 = vld [vmem:[%s2765_s1 + $0xd8] sm:$0xff]  ;;  %v1441_v12 = vld [vmem:[%s2765_s1 + $0xd0] sm:$0xff]  ;;  %s2332_s22 = scalar_lea.vmem %s2233_s28, %s1430_s12  ;;  %vm1339_vm5 = vcmask 1045509   ;;  %vm1341_vm6 = vcmask 1046534   ;;  %vm1343_vm7 = vcmask 1047559  }
  0x12   : >> { %1812 = vmatpush3.msra.mxu1 %v228_v3  ;;  %1775 = vmatprep.subr.mxu0 %v1445_v4  ;;  %v225_v9 = vld [vmem:[%s2765_s1 + $0x60] sm:$0xff]  ;;  %v224_v11 = vld [vmem:[%s2765_s1 + $0x58] sm:$0xff]  ;;  %v223_v13 = vld [vmem:[%s2765_s1 + $0x50] sm:$0xff] }
  0x13   : >> { %1813 = vmatprep.subr.mxu1 %v227_v5  ;;  %1776 = vmatpush3.msra.mxu0 %v1445_v4  ;;  %v1440_v14 = vld [vmem:[%s2765_s1 + $0xc8] sm:$0xff]  ;;  %v1439_v16 = vld [vmem:[%s2765_s1 + $0xc0] sm:$0xff]  ;;  %v1438_v18 = vld [vmem:[%s2765_s1 + $0xb8] sm:$0xff] }
  0x14   : >> { %1814 = vmatpush3.msra.mxu1 %v227_v5  ;;  %1777 = vmatprep.subr.mxu0 %v1444_v6  ;;  %v222_v15 = vld [vmem:[%s2765_s1 + $0x48] sm:$0xff]  ;;  %v221_v17 = vld [vmem:[%s2765_s1 + $0x40] sm:$0xff]  ;;  %v220_v19 = vld [vmem:[%s2765_s1 + $0x38] sm:$0xff] }
  0x15   : >> { %1815 = vmatprep.subr.mxu1 %v226_v7  ;;  %1778 = vmatpush3.msra.mxu0 %v1444_v6  ;;  %v1437_v20 = vld [vmem:[%s2765_s1 + $0xb0] sm:$0xff]  ;;  %v1436_v22 = vld [vmem:[%s2765_s1 + $0xa8] sm:$0xff]  ;;  %v1435_v24 = vld [vmem:[%s2765_s1 + $0xa0] sm:$0xff] }
  0x16   : >> { %1816 = vmatpush3.msra.mxu1 %v226_v7  ;;  %1779 = vmatprep.subr.mxu0 %v1443_v8  ;;  %v219_v21 = vld [vmem:[%s2765_s1 + $0x30] sm:$0xff]  ;;  %v218_v23 = vld [vmem:[%s2765_s1 + $0x28] sm:$0xff]  ;;  %v217_v25 = vld [vmem:[%s2765_s1 + $0x20] sm:$0xff] }
  0x17   : >> { %1817 = vmatprep.subr.mxu1 %v225_v9  ;;  %1780 = vmatpush3.msra.mxu0 %v1443_v8  ;;  %v1434_v26 = vld [vmem:[%s2765_s1 + $0x98] sm:$0xff]  ;;  %v1433_v28 = vld [vmem:[%s2765_s1 + $0x90] sm:$0xff]  ;;  %v1432_v30 = vld [vmem:[%s2765_s1 + $0x88] sm:$0xff] }
  0x18   : >> { %1818 = vmatpush3.msra.mxu1 %v225_v9  ;;  %1781 = vmatprep.subr.mxu0 %v1442_v10  ;;  %v216_v27 = vld [vmem:[%s2765_s1 + $0x18] sm:$0xff]  ;;  %v215_v29 = vld [vmem:[%s2765_s1 + $0x10] sm:$0xff]  ;;  %v214_v31 = vld [vmem:[%s2765_s1 + $0x8] sm:$0xff] }
  0x19   : >> { %1819 = vmatprep.subr.mxu1 %v224_v11  ;;  %1782 = vmatpush3.msra.mxu0 %v1442_v10  ;;  %v1431_v32 = vld [vmem:[%s2765_s1 + $0x80] sm:$0xff]  ;;  %v230_v36 = vld [vmem:[%s2332_s22 + $0x9] sm:$0xff]  ;;  %v1462_v38 = vld [vmem:[%s2765_s1 + $0x178] sm:$0xff] }
  0x1a   : >> { %1820 = vmatpush3.msra.mxu1 %v224_v11  ;;  %1783 = vmatprep.subr.mxu0 %v1441_v12  ;;  %v213_v33 = vld [vmem:[%s2765_s1] sm:$0xff]  ;;  %v210_v37 = vld [vmem:[%s2332_s22 + $0x8] sm:$0xff]  ;;  %v1484_v39 = vld [vmem:[%s2765_s1 + $0x1f8] sm:$0xff] }
  0x1b   : >> { %1821 = vmatprep.subr.mxu1 %v223_v13  ;;  %1784 = vmatpush3.msra.mxu0 %v1441_v12  ;;  %v229_v34 = vld [vmem:[%s2332_s22 + $0x1] sm:$0xff]  ;;  %v1461_v40 = vld [vmem:[%s2765_s1 + $0x170] sm:$0xff]  ;;  %v1458_v46 = vld [vmem:[%s2765_s1 + $0x158] sm:$0xff] }
  0x1c   : >> { %1822 = vmatpush3.msra.mxu1 %v223_v13  ;;  %1785 = vmatprep.subr.mxu0 %v1440_v14  ;;  %v209_v35 = vld [vmem:[%s2332_s22] sm:$0xff]  ;;  %v1483_v41 = vld [vmem:[%s2765_s1 + $0x1f0] sm:$0xff]  ;;  %v1460_v42 = vld [vmem:[%s2765_s1 + $0x168] sm:$0xff] }
  0x1d   : >> { %1823 = vmatprep.subr.mxu1 %v222_v15  ;;  %1786 = vmatpush3.msra.mxu0 %v1440_v14  ;;  %v1482_v43 = vld [vmem:[%s2765_s1 + $0x1e8] sm:$0xff]  ;;  %v1459_v44 = vld [vmem:[%s2765_s1 + $0x160] sm:$0xff]  ;;  %v1480_v47 = vld [vmem:[%s2765_s1 + $0x1d8] sm:$0xff] }
  0x1e   : >> { %1824 = vmatpush3.msra.mxu1 %v222_v15  ;;  %1787 = vmatprep.subr.mxu0 %v1439_v16  ;;  %v1481_v45 = vld [vmem:[%s2765_s1 + $0x1e0] sm:$0xff]  ;;  %v1457_v48 = vld [vmem:[%s2765_s1 + $0x150] sm:$0xff]  ;;  %v1456_v50 = vld [vmem:[%s2765_s1 + $0x148] sm:$0xff] }
  0x1f   : >> { %1825 = vmatprep.subr.mxu1 %v221_v17  ;;  %1788 = vmatpush3.msra.mxu0 %v1439_v16  ;;  %v1479_v49 = vld [vmem:[%s2765_s1 + $0x1d0] sm:$0xff]  ;;  %v1478_v51 = vld [vmem:[%s2765_s1 + $0x1c8] sm:$0xff]  ;;  %v1455_v52 = vld [vmem:[%s2765_s1 + $0x140] sm:$0xff] }
  0x20   : >> { %1826 = vmatpush3.msra.mxu1 %v221_v17  ;;  %1789 = vmatprep.subr.mxu0 %v1438_v18  ;;  %v1477_v53 = vld [vmem:[%s2765_s1 + $0x1c0] sm:$0xff]  ;;  %v1454_v54 = vld [vmem:[%s2765_s1 + $0x138] sm:$0xff]  ;;  %v1453_v56 = vld [vmem:[%s2765_s1 + $0x130] sm:$0xff] }
  0x21   : >> { %1827 = vmatprep.subr.mxu1 %v220_v19  ;;  %1790 = vmatpush3.msra.mxu0 %v1438_v18  ;;  %v1476_v55 = vld [vmem:[%s2765_s1 + $0x1b8] sm:$0xff]  ;;  %v1475_v57 = vld [vmem:[%s2765_s1 + $0x1b0] sm:$0xff]  ;;  %v1452_v58 = vld [vmem:[%s2765_s1 + $0x128] sm:$0xff] }
  0x22   : >> { %1828 = vmatpush3.msra.mxu1 %v220_v19  ;;  %1791 = vmatprep.subr.mxu0 %v1437_v20  ;;  %v1474_v59 = vld [vmem:[%s2765_s1 + $0x1a8] sm:$0xff]  ;;  %v1451_v60 = vld [vmem:[%s2765_s1 + $0x120] sm:$0xff]  ;;  %v1450_v62 = vld [vmem:[%s2765_s1 + $0x118] sm:$0xff] }
  0x23   : >> { %1829 = vmatprep.subr.mxu1 %v219_v21  ;;  %1792 = vmatpush3.msra.mxu0 %v1437_v20  ;;  %v1473_v61 = vld [vmem:[%s2765_s1 + $0x1a0] sm:$0xff]  ;;  %v1472_v63 = vld [vmem:[%s2765_s1 + $0x198] sm:$0xff]  ;;  %v1449_v4 = vld [vmem:[%s2765_s1 + $0x110] sm:$0xff] }
  0x24   : >> { %1830 = vmatpush3.msra.mxu1 %v219_v21  ;;  %1793 = vmatprep.subr.mxu0 %v1436_v22  ;;  %v2423_v2 = vld [vmem:[%s2332_s22 + $0x19] sm:$0xff]  ;;  %v1471_v5 = vld [vmem:[%s2765_s1 + $0x190] sm:$0xff]  ;;  %v2433_v6 = vld [vmem:[%s2332_s22 + $0x21] sm:$0xff] }
  0x25   : >> { %1831 = vmatprep.subr.mxu1 %v218_v23  ;;  %1794 = vmatpush3.msra.mxu0 %v1436_v22  ;;  %v211_v3 = vld [vmem:[%s2332_s22 + $0x18] sm:$0xff]  ;;  %v212_v7 = vld [vmem:[%s2332_s22 + $0x20] sm:$0xff]  ;;  %v1448_v8 = vld [vmem:[%s2765_s1 + $0x108] sm:$0xff] }
  0x26   : >> { %1832 = vmatpush3.msra.mxu1 %v218_v23  ;;  %1795 = vmatprep.subr.mxu0 %v1435_v24  ;;  %v1470_v9 = vld [vmem:[%s2765_s1 + $0x188] sm:$0xff]  ;;  %v1447_v10 = vld [vmem:[%s2765_s1 + $0x100] sm:$0xff]  ;;  %v1504_v14 = vld [vmem:[%s2765_s1 + $0x278] sm:$0xff] }
  0x27   : >> { %1833 = vmatprep.subr.mxu1 %v217_v25  ;;  %1796 = vmatpush3.msra.mxu0 %v1435_v24  ;;  %v1469_v11 = vld [vmem:[%s2765_s1 + $0x180] sm:$0xff]  ;;  %v421_v13 = vld [vmem:[%s2332_s22 + $0xa] sm:$0xff]  ;;  %v1524_v15 = vld [vmem:[%s2765_s1 + $0x2f8] sm:$0xff] }
  0x28   : >> { %1834 = vmatpush3.msra.mxu1 %v217_v25  ;;  %1797 = vmatprep.subr.mxu0 %v1434_v26  ;;  %v420_v12 = vld [vmem:[%s2332_s22 + $0x2] sm:$0xff]  ;;  %v1503_v16 = vld [vmem:[%s2765_s1 + $0x270] sm:$0xff]  ;;  %v2465_v18 = vld [vmem:[%s2332_s22 + $0x1a] sm:$0xff] }
  0x29   : >> { %1835 = vmatprep.subr.mxu1 %v216_v27  ;;  %1798 = vmatpush3.msra.mxu0 %v1434_v26  ;;  %v1523_v17 = vld [vmem:[%s2765_s1 + $0x2f0] sm:$0xff]  ;;  %v2468_v19 = vld [vmem:[%s2332_s22 + $0x22] sm:$0xff]  ;;  %v2485_v24 = vld [vmem:[%s2332_s22 + $0x38] sm:$0xff] }
  0x2a   : >> { %1836 = vmatpush3.msra.mxu1 %v216_v27  ;;  %1799 = vmatprep.subr.mxu0 %v1433_v28  ;;  %v1502_v20 = vld [vmem:[%s2765_s1 + $0x268] sm:$0xff]  ;;  %v2478_v22 = vld [vmem:[%s2332_s22 + $0x30] sm:$0xff]  ;;  %v1501_v23 = vld [vmem:[%s2765_s1 + $0x260] sm:$0xff] }
  0x2b   : >> { %1837 = vmatprep.subr.mxu1 %v215_v29  ;;  %1800 = vmatpush3.msra.mxu0 %v1433_v28  ;;  %v1522_v21 = vld [vmem:[%s2765_s1 + $0x2e8] sm:$0xff]  ;;  %v1521_v25 = vld [vmem:[%s2765_s1 + $0x2e0] sm:$0xff]  ;;  %v1500_v26 = vld [vmem:[%s2765_s1 + $0x258] sm:$0xff] }
  0x2c   : >> { %1838 = vmatpush3.msra.mxu1 %v215_v29  ;;  %1801 = vmatprep.subr.mxu0 %v1432_v30  ;;  %v1520_v27 = vld [vmem:[%s2765_s1 + $0x2d8] sm:$0xff]  ;;  %v1499_v28 = vld [vmem:[%s2765_s1 + $0x250] sm:$0xff] }
  0x2d   : >> { %1839 = vmatprep.subr.mxu1 %v214_v31  ;;  %1802 = vmatpush3.msra.mxu0 %v1432_v30  ;;  %v1519_v29 = vld [vmem:[%s2765_s1 + $0x2d0] sm:$0xff]  ;;  %v1498_v30 = vld [vmem:[%s2765_s1 + $0x248] sm:$0xff] }
  0x2e   : >> { %1840 = vmatpush3.msra.mxu1 %v214_v31  ;;  %1803 = vmatprep.subr.mxu0 %v1431_v32  ;;  %v1518_v31 = vld [vmem:[%s2765_s1 + $0x2c8] sm:$0xff] }
  0x2f   : >> { %1841 = vmatprep.subr.mxu1 %v213_v33  ;;  %1804 = vmatpush3.msra.mxu0 %v1431_v32  ;;  %v1497_v32 = vld [vmem:[%s2765_s1 + $0x240] sm:$0xff] }
  0x30   : >> { %1805 = vmatprep.mubr.f32.mxu0 %v229_v34  ;;  %1842 = vmatpush3.msra.mxu1 %v213_v33  ;;  %v1517_v33 = vld [vmem:[%s2765_s1 + $0x2c0] sm:$0xff]  ;;  %v1496_v34 = vld [vmem:[%s2765_s1 + $0x238] sm:$0xff] }
  0x31   : >> { %1843 = vmatprep.mubr.f32.mxu1 %v209_v35  ;;  %1806 = vmatmul.mubr.f32.vlgmr.msra.gmra.mxu0 %v230_v36  ;;  %v1516_v35 = vld [vmem:[%s2765_s1 + $0x2b8] sm:$0xff]  ;;  %v1495_v36 = vld [vmem:[%s2765_s1 + $0x230] sm:$0xff] }
  0x32   : >> { %1844 = vmatmul.mubr.f32.vlgmr.msra.gmra.mxu1 %v210_v37  ;;  %1849 = vmatprep.subr.mxu0 %v1462_v38  ;;  %v1515_v37 = vld [vmem:[%s2765_s1 + $0x2b0] sm:$0xff] }
  0x33   : >> { %1887 = vmatprep.subr.mxu1 %v1484_v39  ;;  %1850 = vmatpush3.msra.mxu0 %v1462_v38  ;;  %v1494_v38 = vld [vmem:[%s2765_s1 + $0x228] sm:$0xff] }
  0x34   : >> { %1888 = vmatpush3.msra.mxu1 %v1484_v39  ;;  %1851 = vmatprep.subr.mxu0 %v1461_v40  ;;  %v1514_v39 = vld [vmem:[%s2765_s1 + $0x2a8] sm:$0xff] }
  0x35   : >> { %1889 = vmatprep.subr.mxu1 %v1483_v41  ;;  %1852 = vmatpush3.msra.mxu0 %v1461_v40  ;;  %v1493_v40 = vld [vmem:[%s2765_s1 + $0x220] sm:$0xff] }
  0x36   : >> { %1890 = vmatpush3.msra.mxu1 %v1483_v41  ;;  %1853 = vmatprep.subr.mxu0 %v1460_v42  ;;  %v1513_v41 = vld [vmem:[%s2765_s1 + $0x2a0] sm:$0xff] }
  0x37   : >> { %1891 = vmatprep.subr.mxu1 %v1482_v43  ;;  %1854 = vmatpush3.msra.mxu0 %v1460_v42  ;;  %v1492_v42 = vld [vmem:[%s2765_s1 + $0x218] sm:$0xff] }
  0x38   : >> { %1892 = vmatpush3.msra.mxu1 %v1482_v43  ;;  %1855 = vmatprep.subr.mxu0 %v1459_v44  ;;  %v1512_v43 = vld [vmem:[%s2765_s1 + $0x298] sm:$0xff] }
  0x39   : >> { %1893 = vmatprep.subr.mxu1 %v1481_v45  ;;  %1856 = vmatpush3.msra.mxu0 %v1459_v44  ;;  %v1491_v44 = vld [vmem:[%s2765_s1 + $0x210] sm:$0xff] }
  0x3a   : >> { %1894 = vmatpush3.msra.mxu1 %v1481_v45  ;;  %1857 = vmatprep.subr.mxu0 %v1458_v46  ;;  %v1511_v45 = vld [vmem:[%s2765_s1 + $0x290] sm:$0xff] }
  0x3b   : >> { %1895 = vmatprep.subr.mxu1 %v1480_v47  ;;  %1858 = vmatpush3.msra.mxu0 %v1458_v46  ;;  %v1490_v46 = vld [vmem:[%s2765_s1 + $0x208] sm:$0xff] }
  0x3c   : >> { %1896 = vmatpush3.msra.mxu1 %v1480_v47  ;;  %1859 = vmatprep.subr.mxu0 %v1457_v48  ;;  %v1510_v47 = vld [vmem:[%s2765_s1 + $0x288] sm:$0xff] }
  0x3d   : >> { %1897 = vmatprep.subr.mxu1 %v1479_v49  ;;  %1860 = vmatpush3.msra.mxu0 %v1457_v48  ;;  %v1489_v48 = vld [vmem:[%s2765_s1 + $0x200] sm:$0xff] }
  0x3e   : >> { %1898 = vmatpush3.msra.mxu1 %v1479_v49  ;;  %1861 = vmatprep.subr.mxu0 %v1456_v50  ;;  %v1509_v49 = vld [vmem:[%s2765_s1 + $0x280] sm:$0xff] }
  0x3f   : >> { %1899 = vmatprep.subr.mxu1 %v1478_v51  ;;  %1862 = vmatpush3.msra.mxu0 %v1456_v50  ;;  %v1546_v50 = vld [vmem:[%s2765_s1 + $0x378] sm:$0xff] }
  0x40   : >> { %1900 = vmatpush3.msra.mxu1 %v1478_v51  ;;  %1863 = vmatprep.subr.mxu0 %v1455_v52  ;;  %v1566_v51 = vld [vmem:[%s2765_s1 + $0x3f8] sm:$0xff] }
  0x41   : >> { %1901 = vmatprep.subr.mxu1 %v1477_v53  ;;  %1864 = vmatpush3.msra.mxu0 %v1455_v52  ;;  %v1545_v52 = vld [vmem:[%s2765_s1 + $0x370] sm:$0xff] }
  0x42   : >> { %1902 = vmatpush3.msra.mxu1 %v1477_v53  ;;  %1865 = vmatprep.subr.mxu0 %v1454_v54  ;;  %v1565_v53 = vld [vmem:[%s2765_s1 + $0x3f0] sm:$0xff] }
  0x43   : >> { %1903 = vmatprep.subr.mxu1 %v1476_v55  ;;  %1866 = vmatpush3.msra.mxu0 %v1454_v54  ;;  %v2581_v54 = vld [vmem:[%s2332_s22 + $0x31] sm:$0xff] }
  0x44   : >> { %1904 = vmatpush3.msra.mxu1 %v1476_v55  ;;  %1867 = vmatprep.subr.mxu0 %v1453_v56  ;;  %v2584_v55 = vld [vmem:[%s2332_s22 + $0x39] sm:$0xff] }
  0x45   : >> { %1905 = vmatprep.subr.mxu1 %v1475_v57  ;;  %1868 = vmatpush3.msra.mxu0 %v1453_v56  ;;  %v1544_v56 = vld [vmem:[%s2765_s1 + $0x368] sm:$0xff] }
  0x46   : >> { %1906 = vmatpush3.msra.mxu1 %v1475_v57  ;;  %1869 = vmatprep.subr.mxu0 %v1452_v58  ;;  %v1564_v57 = vld [vmem:[%s2765_s1 + $0x3e8] sm:$0xff] }
  0x47   : >> { %1907 = vmatprep.subr.mxu1 %v1474_v59  ;;  %1870 = vmatpush3.msra.mxu0 %v1452_v58  ;;  %v2594_v58 = vld [vmem:[%s2332_s22 + $0x32] sm:$0xff] }
  0x48   : >> { %1908 = vmatpush3.msra.mxu1 %v1474_v59  ;;  %1871 = vmatprep.subr.mxu0 %v1451_v60  ;;  %v1543_v59 = vld [vmem:[%s2765_s1 + $0x360] sm:$0xff] }
  0x49   : >> { %1909 = vmatprep.subr.mxu1 %v1473_v61  ;;  %1872 = vmatpush3.msra.mxu0 %v1451_v60  ;;  %v2601_v60 = vld [vmem:[%s2332_s22 + $0x3a] sm:$0xff] }
  0x4a   : >> { %1910 = vmatpush3.msra.mxu1 %v1473_v61  ;;  %1873 = vmatprep.subr.mxu0 %v1450_v62  ;;  %v1563_v61 = vld [vmem:[%s2765_s1 + $0x3e0] sm:$0xff] }
  0x4b   : >> { %1911 = vmatprep.subr.mxu1 %v1472_v63  ;;  %1874 = vmatpush3.msra.mxu0 %v1450_v62  ;;  %v1542_v62 = vld [vmem:[%s2765_s1 + $0x358] sm:$0xff] }
  0x4c   : >> { %1912 = vmatpush3.msra.mxu1 %v1472_v63  ;;  %1808 = vmatprep.mubr.f32.mxu0 %v2423_v2  ;;  %v1562_v63 = vld [vmem:[%s2765_s1 + $0x3d8] sm:$0xff] }
  0x4d   : >> { %1846 = vmatprep.mubr.f32.mxu1 %v211_v3  ;;  %1875 = vmatprep.subr.mxu0 %v1449_v4 }
  0x4e   : >> { %1913 = vmatprep.subr.mxu1 %v1471_v5  ;;  %1809 = vmatmul.mubr.f32.gmra.mxu0 %v2433_v6 }
  0x4f   : >> { %1847 = vmatmul.mubr.f32.gmra.mxu1 %v212_v7  ;;  %1876 = vmatpush3.msra.mxu0 %v1449_v4  ;;  %v1540_v4 = vld [vmem:[%s2765_s1 + $0x348] sm:$0xff] }
  0x50   : >> { %1914 = vmatpush3.msra.mxu1 %v1471_v5  ;;  %1877 = vmatprep.subr.mxu0 %v1448_v8  ;;  %v1560_v5 = vld [vmem:[%s2765_s1 + $0x3c8] sm:$0xff] }
  0x51   : >> { %1915 = vmatprep.subr.mxu1 %v1470_v9  ;;  %1878 = vmatpush3.msra.mxu0 %v1448_v8  ;;  %v1538_v8 = vld [vmem:[%s2765_s1 + $0x338] sm:$0xff] }
  0x52   : >> { %1916 = vmatpush3.msra.mxu1 %v1470_v9  ;;  %1879 = vmatprep.subr.mxu0 %v1447_v10  ;;  %v1558_v9 = vld [vmem:[%s2765_s1 + $0x3b8] sm:$0xff] }
  0x53   : >> { %1917 = vmatprep.subr.mxu1 %v1469_v11  ;;  %1880 = vmatpush3.msra.mxu0 %v1447_v10  ;;  %v1537_v10 = vld [vmem:[%s2765_s1 + $0x330] sm:$0xff] }
  0x54   : >> { %1881 = vmatprep.mubr.f32.mxu0 %v420_v12  ;;  %1918 = vmatpush3.msra.mxu1 %v1469_v11  ;;  %v1557_v11 = vld [vmem:[%s2765_s1 + $0x3b0] sm:$0xff]  ;;  %v1536_v12 = vld [vmem:[%s2765_s1 + $0x328] sm:$0xff] }
  0x55   : >> { %1919 = vmatprep.mubr.f32.mxu1 %v211_v3  ;;  %1882 = vmatmul.mubr.f32.vlgmr.msra.gmra.mxu0 %v421_v13  ;;  %v1561_v3 = vld [vmem:[%s2765_s1 + $0x3d0] sm:$0xff]  ;;  %v1556_v13 = vld [vmem:[%s2765_s1 + $0x3a8] sm:$0xff] }
  0x56   : >> { %1920 = vmatmul.mubr.f32.vlgmr.msra.gmra.mxu1 %v212_v7  ;;  %1925 = vmatprep.subr.mxu0 %v1504_v14  ;;  %v1559_v7 = vld [vmem:[%s2765_s1 + $0x3c0] sm:$0xff] }
  0x57   : >> { %1963 = vmatprep.subr.mxu1 %v1524_v15  ;;  %1926 = vmatpush3.msra.mxu0 %v1504_v14  ;;  %v1535_v14 = vld [vmem:[%s2765_s1 + $0x320] sm:$0xff] }
  0x58   : >> { %1964 = vmatpush3.msra.mxu1 %v1524_v15  ;;  %1927 = vmatprep.subr.mxu0 %v1503_v16  ;;  %v1555_v15 = vld [vmem:[%s2765_s1 + $0x3a0] sm:$0xff] }
  0x59   : >> { %1965 = vmatprep.subr.mxu1 %v1523_v17  ;;  %1884 = vmatprep.mubr.f32.mxu0 %v2465_v18 }
  0x5a   : >> { %1928 = vmatpush3.msra.mxu0 %v1503_v16  ;;  %1966 = vmatpush3.msra.mxu1 %v1523_v17  ;;  %v1534_v16 = vld [vmem:[%s2765_s1 + $0x318] sm:$0xff] }
  0x5b   : >> { %1885 = vmatmul.mubr.f32.gmra.mxu0 %v2468_v19  ;;  %1929 = vmatprep.subr.mxu0 %v1502_v20  ;;  %v1554_v17 = vld [vmem:[%s2765_s1 + $0x398] sm:$0xff] }
  0x5c   : >> { %1967 = vmatprep.subr.mxu1 %v1522_v21  ;;  %1922 = vmatprep.mubr.f32.mxu1 %v2478_v22 }
  0x5d   : >> { %1930 = vmatpush3.msra.mxu0 %v1502_v20  ;;  %1968 = vmatpush3.msra.mxu1 %v1522_v21  ;;  %v1532_v20 = vld [vmem:[%s2765_s1 + $0x308] sm:$0xff] }
  0x5e   : >> { %1931 = vmatprep.subr.mxu0 %v1501_v23  ;;  %1923 = vmatmul.mubr.f32.gmra.mxu1 %v2485_v24  ;;  %v1552_v21 = vld [vmem:[%s2765_s1 + $0x388] sm:$0xff] }
  0x5f   : >> { %1969 = vmatprep.subr.mxu1 %v1521_v25  ;;  %1932 = vmatpush3.msra.mxu0 %v1501_v23  ;;  %v1531_v23 = vld [vmem:[%s2765_s1 + $0x300] sm:$0xff] }
  0x60   : >> { %1970 = vmatpush3.msra.mxu1 %v1521_v25  ;;  %1933 = vmatprep.subr.mxu0 %v1500_v26  ;;  %v1551_v25 = vld [vmem:[%s2765_s1 + $0x380] sm:$0xff] }
  0x61   : >> { %1971 = vmatprep.subr.mxu1 %v1520_v27  ;;  %1934 = vmatpush3.msra.mxu0 %v1500_v26  ;;  %v1586_v26 = vld [vmem:[%s2765_s1 + $0x478] sm:$0xff] }
  0x62   : >> { %1972 = vmatpush3.msra.mxu1 %v1520_v27  ;;  %1935 = vmatprep.subr.mxu0 %v1499_v28  ;;  %v1585_v27 = vld [vmem:[%s2765_s1 + $0x470] sm:$0xff] }
  0x63   : >> { %1973 = vmatprep.subr.mxu1 %v1519_v29  ;;  %1936 = vmatpush3.msra.mxu0 %v1499_v28  ;;  %v1530_v28 = vld [vmem:[%s2332_s22 + $0x50] sm:$0xff] }
  0x64   : >> { %1974 = vmatpush3.msra.mxu1 %v1519_v29  ;;  %1937 = vmatprep.subr.mxu0 %v1498_v30  ;;  %v1584_v29 = vld [vmem:[%s2765_s1 + $0x468] sm:$0xff] }
  0x65   : >> { %1975 = vmatprep.subr.mxu1 %v1518_v31  ;;  %1938 = vmatpush3.msra.mxu0 %v1498_v30  ;;  %v1583_v30 = vld [vmem:[%s2765_s1 + $0x460] sm:$0xff] }
  0x66   : >> { %1976 = vmatpush3.msra.mxu1 %v1518_v31  ;;  %1939 = vmatprep.subr.mxu0 %v1497_v32  ;;  %v1550_v31 = vld [vmem:[%s2332_s22 + $0x51] sm:$0xff] }
  0x67   : >> { %1977 = vmatprep.subr.mxu1 %v1517_v33  ;;  %1940 = vmatpush3.msra.mxu0 %v1497_v32  ;;  %v1582_v32 = vld [vmem:[%s2765_s1 + $0x458] sm:$0xff] }
  0x68   : >> { %1978 = vmatpush3.msra.mxu1 %v1517_v33  ;;  %1941 = vmatprep.subr.mxu0 %v1496_v34  ;;  %v1581_v33 = vld [vmem:[%s2765_s1 + $0x450] sm:$0xff] }
  0x69   : >> { %1979 = vmatprep.subr.mxu1 %v1516_v35  ;;  %1942 = vmatpush3.msra.mxu0 %v1496_v34  ;;  %v1580_v34 = vld [vmem:[%s2765_s1 + $0x448] sm:$0xff] }
  0x6a   : >> { %1980 = vmatpush3.msra.mxu1 %v1516_v35  ;;  %1943 = vmatprep.subr.mxu0 %v1495_v36  ;;  %v1579_v35 = vld [vmem:[%s2765_s1 + $0x440] sm:$0xff] }
  0x6b   : >> { %1981 = vmatprep.subr.mxu1 %v1515_v37  ;;  %1944 = vmatpush3.msra.mxu0 %v1495_v36  ;;  %v1578_v36 = vld [vmem:[%s2765_s1 + $0x438] sm:$0xff] }
  0x6c   : >> { %1982 = vmatpush3.msra.mxu1 %v1515_v37  ;;  %1945 = vmatprep.subr.mxu0 %v1494_v38  ;;  %v1577_v37 = vld [vmem:[%s2765_s1 + $0x430] sm:$0xff] }
  0x6d   : >> { %1983 = vmatprep.subr.mxu1 %v1514_v39  ;;  %1946 = vmatpush3.msra.mxu0 %v1494_v38  ;;  %v1576_v38 = vld [vmem:[%s2765_s1 + $0x428] sm:$0xff] }
  0x6e   : >> { %1984 = vmatpush3.msra.mxu1 %v1514_v39  ;;  %1947 = vmatprep.subr.mxu0 %v1493_v40  ;;  %v1575_v39 = vld [vmem:[%s2765_s1 + $0x420] sm:$0xff] }
  0x6f   : >> { %1985 = vmatprep.subr.mxu1 %v1513_v41  ;;  %1948 = vmatpush3.msra.mxu0 %v1493_v40  ;;  %v1574_v40 = vld [vmem:[%s2765_s1 + $0x418] sm:$0xff] }
  0x70   : >> { %1986 = vmatpush3.msra.mxu1 %v1513_v41  ;;  %1949 = vmatprep.subr.mxu0 %v1492_v42  ;;  %v1573_v41 = vld [vmem:[%s2765_s1 + $0x410] sm:$0xff] }
  0x71   : >> { %1987 = vmatprep.subr.mxu1 %v1512_v43  ;;  %1950 = vmatpush3.msra.mxu0 %v1492_v42  ;;  %v1572_v42 = vld [vmem:[%s2765_s1 + $0x408] sm:$0xff] }
  0x72   : >> { %1988 = vmatpush3.msra.mxu1 %v1512_v43  ;;  %1951 = vmatprep.subr.mxu0 %v1491_v44  ;;  %v1571_v43 = vld [vmem:[%s2765_s1 + $0x400] sm:$0xff] }
  0x73   : >> { %1989 = vmatprep.subr.mxu1 %v1511_v45  ;;  %1952 = vmatpush3.msra.mxu0 %v1491_v44  ;;  %v1569_v44 = vld [vmem:[%s2332_s22 + $0x4a] sm:$0xff] }
  0x74   : >> { %1990 = vmatpush3.msra.mxu1 %v1511_v45  ;;  %1953 = vmatprep.subr.mxu0 %v1490_v46  ;;  %v1570_v45 = vld [vmem:[%s2332_s22 + $0x52] sm:$0xff] }
  0x75   : >> { %1991 = vmatprep.subr.mxu1 %v1510_v47  ;;  %1954 = vmatpush3.msra.mxu0 %v1490_v46 }
  0x76   : >> { %1992 = vmatpush3.msra.mxu1 %v1510_v47  ;;  %1955 = vmatprep.subr.mxu0 %v1489_v48 }
  0x77   : >> { %1993 = vmatprep.subr.mxu1 %v1509_v49  ;;  %1956 = vmatpush3.msra.mxu0 %v1489_v48 }
  0x78   : >> { %1957 = vmatprep.mubr.f32.mxu0 %v2423_v2  ;;  %1994 = vmatpush3.msra.mxu1 %v1509_v49  ;;  %v1541_v2 = vld [vmem:[%s2765_s1 + $0x350] sm:$0xff] }
  0x79   : >> { %1995 = vmatprep.mubr.f32.mxu1 %v2465_v18  ;;  %1958 = vmatmul.mubr.f32.vlgmr.msra.gmra.mxu0 %v2433_v6  ;;  %v1539_v6 = vld [vmem:[%s2765_s1 + $0x340] sm:$0xff]  ;;  %v1533_v18 = vld [vmem:[%s2765_s1 + $0x310] sm:$0xff] }
  0x7a   : >> { %1996 = vmatmul.mubr.f32.vlgmr.msra.gmra.mxu1 %v2468_v19  ;;  %2001 = vmatprep.subr.mxu0 %v1546_v50  ;;  %v1553_v19 = vld [vmem:[%s2765_s1 + $0x390] sm:$0xff] }
  0x7b   : >> { %2039 = vmatprep.subr.mxu1 %v1566_v51  ;;  %2002 = vmatpush3.msra.mxu0 %v1546_v50 }
  0x7c   : >> { %2040 = vmatpush3.msra.mxu1 %v1566_v51  ;;  %2003 = vmatprep.subr.mxu0 %v1545_v52 }
  0x7d   : >> { %2041 = vmatprep.subr.mxu1 %v1565_v53  ;;  %1960 = vmatprep.mubr.f32.mxu0 %v2581_v54 }
  0x7e   : >> { %2004 = vmatpush3.msra.mxu0 %v1545_v52  ;;  %2042 = vmatpush3.msra.mxu1 %v1565_v53 }
  0x7f   : >> { %1961 = vmatmul.mubr.f32.gmra.mxu0 %v2584_v55  ;;  %2005 = vmatprep.subr.mxu0 %v1544_v56 }
  0x80   : >> { %2043 = vmatprep.subr.mxu1 %v1564_v57  ;;  %1998 = vmatprep.mubr.f32.mxu1 %v2594_v58 }
  0x81   : >> { %2006 = vmatpush3.msra.mxu0 %v1544_v56  ;;  %2044 = vmatpush3.msra.mxu1 %v1564_v57 }
  0x82   : >> { %2007 = vmatprep.subr.mxu0 %v1543_v59  ;;  %1999 = vmatmul.mubr.f32.gmra.mxu1 %v2601_v60 }
  0x83   : >> { %2045 = vmatprep.subr.mxu1 %v1563_v61  ;;  %2008 = vmatpush3.msra.mxu0 %v1543_v59 }
  0x84   : >> { %2046 = vmatpush3.msra.mxu1 %v1563_v61  ;;  %2009 = vmatprep.subr.mxu0 %v1542_v62 }
  0x85   : >> { %2047 = vmatprep.subr.mxu1 %v1562_v63  ;;  %2010 = vmatpush3.msra.mxu0 %v1542_v62 }
  0x86   : >> { %2048 = vmatpush3.msra.mxu1 %v1562_v63  ;;  %2011 = vmatprep.subr.mxu0 %v1541_v2 }
  0x87   : >> { %2049 = vmatprep.subr.mxu1 %v1561_v3  ;;  %2012 = vmatpush3.msra.mxu0 %v1541_v2 }
  0x88   : >> { %2050 = vmatpush3.msra.mxu1 %v1561_v3  ;;  %2013 = vmatprep.subr.mxu0 %v1540_v4 }
  0x89   : >> { %2051 = vmatprep.subr.mxu1 %v1560_v5  ;;  %2014 = vmatpush3.msra.mxu0 %v1540_v4 }
  0x8a   : >> { %2052 = vmatpush3.msra.mxu1 %v1560_v5  ;;  %2015 = vmatprep.subr.mxu0 %v1539_v6 }
  0x8b   : >> { %2053 = vmatprep.subr.mxu1 %v1559_v7  ;;  %2016 = vmatpush3.msra.mxu0 %v1539_v6 }
  0x8c   : >> { %2054 = vmatpush3.msra.mxu1 %v1559_v7  ;;  %2017 = vmatprep.subr.mxu0 %v1538_v8 }
  0x8d   : >> { %2055 = vmatprep.subr.mxu1 %v1558_v9  ;;  %2018 = vmatpush3.msra.mxu0 %v1538_v8 }
  0x8e   : >> { %2056 = vmatpush3.msra.mxu1 %v1558_v9  ;;  %2019 = vmatprep.subr.mxu0 %v1537_v10 }
  0x8f   : >> { %2057 = vmatprep.subr.mxu1 %v1557_v11  ;;  %2020 = vmatpush3.msra.mxu0 %v1537_v10 }
  0x90   : >> { %2058 = vmatpush3.msra.mxu1 %v1557_v11  ;;  %2021 = vmatprep.subr.mxu0 %v1536_v12 }
  0x91   : >> { %2059 = vmatprep.subr.mxu1 %v1556_v13  ;;  %2022 = vmatpush3.msra.mxu0 %v1536_v12 }
  0x92   : >> { %2060 = vmatpush3.msra.mxu1 %v1556_v13  ;;  %2023 = vmatprep.subr.mxu0 %v1535_v14 }
  0x93   : >> { %2061 = vmatprep.subr.mxu1 %v1555_v15  ;;  %2024 = vmatpush3.msra.mxu0 %v1535_v14 }
  0x94   : >> { %2062 = vmatpush3.msra.mxu1 %v1555_v15  ;;  %2025 = vmatprep.subr.mxu0 %v1534_v16 }
  0x95   : >> { %2063 = vmatprep.subr.mxu1 %v1554_v17  ;;  %2026 = vmatpush3.msra.mxu0 %v1534_v16 }
  0x96   : >> { %2064 = vmatpush3.msra.mxu1 %v1554_v17  ;;  %2027 = vmatprep.subr.mxu0 %v1533_v18 }
  0x97   : >> { %2065 = vmatprep.subr.mxu1 %v1553_v19  ;;  %2028 = vmatpush3.msra.mxu0 %v1533_v18 }
  0x98   : >> { %2066 = vmatpush3.msra.mxu1 %v1553_v19  ;;  %2029 = vmatprep.subr.mxu0 %v1532_v20 }
  0x99   : >> { %2067 = vmatprep.subr.mxu1 %v1552_v21  ;;  %2030 = vmatpush3.msra.mxu0 %v1532_v20 }
  0x9a   : >> { %2068 = vmatpush3.msra.mxu1 %v1552_v21  ;;  %2031 = vmatprep.subr.mxu0 %v1531_v23 }
  0x9b   : >> { %2069 = vmatprep.subr.mxu1 %v1551_v25  ;;  %2032 = vmatpush3.msra.mxu0 %v1531_v23 }
  0x9c   : >> { %2033 = vmatprep.mubr.f32.mxu0 %v2478_v22  ;;  %2070 = vmatpush3.msra.mxu1 %v1551_v25  ;;  %v1529_v22 = vld [vmem:[%s2332_s22 + $0x48] sm:$0xff] }
  0x9d   : >> { %2071 = vmatprep.mubr.f32.mxu1 %v2581_v54  ;;  %2034 = vmatmul.mubr.f32.vlgmr.msra.gmra.mxu0 %v2485_v24  ;;  %v1549_v24 = vld [vmem:[%s2332_s22 + $0x49] sm:$0xff]  ;;  %s1589_s22 = sshll.u32 %s2179_s29, 3  ;;  %s205_s29 = sadd.s32 1, %s2179_s29  }
  0x9e   : >> { %2072 = vmatmul.mubr.f32.vlgmr.msra.gmra.mxu1 %v2584_v55  ;;  %2077 = vmatprep.subr.mxu0 %v1586_v26  ;;  %s1347_s19 = scalar_lea.vmem %s2228_s25, %s1589_s22  ;;  %p202_p4 = scmp.ge.s32.totalorder %s205_s29, 8  }
  0x9f   : >> { %2115 = vmatprep.subr.mxu1 %v1586_v26  ;;  %2078 = vmatpush3.msra.mxu0 %v1586_v26 }
  0xa0   : >> { %2131 = vmatpush3.msra.mxu1 %v1586_v26  ;;  %2079 = vmatprep.subr.mxu0 %v1585_v27 }
  0xa1   : >> { %2116 = vmatprep.subr.mxu1 %v1585_v27  ;;  %2036 = vmatprep.mubr.f32.mxu0 %v1529_v22 }
  0xa2   : >> { %2080 = vmatpush3.msra.mxu0 %v1585_v27  ;;  %2132 = vmatpush3.msra.mxu1 %v1585_v27 }
  0xa3   : >> { %2037 = vmatmul.mubr.f32.gmra.mxu0 %v1530_v28  ;;  %2081 = vmatprep.subr.mxu0 %v1584_v29 }
  0xa4   : >> { %2117 = vmatprep.subr.mxu1 %v1584_v29  ;;  %2074 = vmatprep.mubr.f32.mxu1 %v1549_v24 }
  0xa5   : >> { %2082 = vmatpush3.msra.mxu0 %v1584_v29  ;;  %2133 = vmatpush3.msra.mxu1 %v1584_v29 }
  0xa6   : >> { %2083 = vmatprep.subr.mxu0 %v1583_v30  ;;  %2075 = vmatmul.mubr.f32.gmra.mxu1 %v1550_v31 }
  0xa7   : >> { %2118 = vmatprep.subr.mxu1 %v1583_v30  ;;  %2084 = vmatpush3.msra.mxu0 %v1583_v30 }
  0xa8   : >> { %2134 = vmatpush3.msra.mxu1 %v1583_v30  ;;  %2085 = vmatprep.subr.mxu0 %v1582_v32 }
  0xa9   : >> { %2119 = vmatprep.subr.mxu1 %v1582_v32  ;;  %2086 = vmatpush3.msra.mxu0 %v1582_v32 }
  0xaa   : >> { %2135 = vmatpush3.msra.mxu1 %v1582_v32  ;;  %2087 = vmatprep.subr.mxu0 %v1581_v33 }
  0xab   : >> { %2120 = vmatprep.subr.mxu1 %v1581_v33  ;;  %2088 = vmatpush3.msra.mxu0 %v1581_v33 }
  0xac   : >> { %2136 = vmatpush3.msra.mxu1 %v1581_v33  ;;  %2089 = vmatprep.subr.mxu0 %v1580_v34 }
  0xad   : >> { %2121 = vmatprep.subr.mxu1 %v1580_v34  ;;  %2090 = vmatpush3.msra.mxu0 %v1580_v34 }
  0xae   : >> { %2137 = vmatpush3.msra.mxu1 %v1580_v34  ;;  %2091 = vmatprep.subr.mxu0 %v1579_v35 }
  0xaf   : >> { %2122 = vmatprep.subr.mxu1 %v1579_v35  ;;  %2092 = vmatpush3.msra.mxu0 %v1579_v35 }
  0xb0   : >> { %2138 = vmatpush3.msra.mxu1 %v1579_v35  ;;  %2093 = vmatprep.subr.mxu0 %v1578_v36 }
  0xb1   : >> { %2123 = vmatprep.subr.mxu1 %v1578_v36  ;;  %2094 = vmatpush3.msra.mxu0 %v1578_v36 }
  0xb2   : >> { %2139 = vmatpush3.msra.mxu1 %v1578_v36  ;;  %2095 = vmatprep.subr.mxu0 %v1577_v37 }
  0xb3   : >> { %2124 = vmatprep.subr.mxu1 %v1577_v37  ;;  %2096 = vmatpush3.msra.mxu0 %v1577_v37 }
  0xb4   : >> { %2140 = vmatpush3.msra.mxu1 %v1577_v37  ;;  %2097 = vmatprep.subr.mxu0 %v1576_v38 }
  0xb5   : >> { %2125 = vmatprep.subr.mxu1 %v1576_v38  ;;  %2098 = vmatpush3.msra.mxu0 %v1576_v38 }
  0xb6   : >> { %2141 = vmatpush3.msra.mxu1 %v1576_v38  ;;  %2099 = vmatprep.subr.mxu0 %v1575_v39 }
  0xb7   : >> { %2126 = vmatprep.subr.mxu1 %v1575_v39  ;;  %2100 = vmatpush3.msra.mxu0 %v1575_v39 }
  0xb8   : >> { %2142 = vmatpush3.msra.mxu1 %v1575_v39  ;;  %2101 = vmatprep.subr.mxu0 %v1574_v40 }
  0xb9   : >> { %2127 = vmatprep.subr.mxu1 %v1574_v40  ;;  %2102 = vmatpush3.msra.mxu0 %v1574_v40 }
  0xba   : >> { %2143 = vmatpush3.msra.mxu1 %v1574_v40  ;;  %2103 = vmatprep.subr.mxu0 %v1573_v41  ;;  %v2181_v40 = vmov 1983009808  }
  0xbb   : >> { %2128 = vmatprep.subr.mxu1 %v1573_v41  ;;  %2104 = vmatpush3.msra.mxu0 %v1573_v41 }
  0xbc   : >> { %2144 = vmatpush3.msra.mxu1 %v1573_v41  ;;  %2105 = vmatprep.subr.mxu0 %v1572_v42  ;;  %v1226_v41 = vunpack.c.l.s4 %v2181_v40 }
  0xbd   : >> { %2129 = vmatprep.subr.mxu1 %v1572_v42  ;;  %2106 = vmatpush3.msra.mxu0 %v1572_v42 }
  0xbe   : >> { %2145 = vmatpush3.msra.mxu1 %v1572_v42  ;;  %2107 = vmatprep.subr.mxu0 %v1571_v43  ;;  %v1228_v42 = vlaneseq }
  0xbf   : >> { %2130 = vmatprep.subr.mxu1 %v1571_v43  ;;  %2108 = vmatpush3.msra.mxu0 %v1571_v43 }
  0xc0   : >> { %2146 = vmatpush3.msra.mxu1 %v1571_v43  ;;  %2109 = vmatprep.mubr.f32.mxu0 %v2594_v58 }
  0xc1   : >> { %2112 = vmatprep.mubr.f32.mxu1 %v1569_v44  ;;  %2110 = vmatmul.mubr.f32.vlgmr.msra.gmra.mxu0 %v2601_v60 }
  0xc2   : >> { %2113 = vmatmul.mubr.f32.vlgmr.msra.gmra.mxu1 %v1570_v45 }
  0xf1   : >> { %v1807_v46 = vpop.f32.mrf.mxu0 }
  0xf2   : >> { %v1845_v49 = vpop.f32.mrf.mxu1 }
  0xf3   : >> { %v316_v47 = vpop.f32.mrf.mxu0  ;;  %v407_v6 = vadd.f32 %v1845_v49, %v1807_v46 }
  0xf4   : >> { %v401_v51 = vpop.f32.mrf.mxu1 }
  0xf5   : >> { %v402_v10 = vadd.f32 %v401_v51, %v316_v47  ;;  %v1227_v51 = vunpack.c.0.s8 %v1226_v41 }
 0x10e   : >> { %v1810_v48 = vpop.f32.mrf.mxu0 }
 0x10f   : >> { %v1848_v53 = vpop.f32.mrf.mxu1 }
 0x110   : >> { %v326_v50 = vpop.f32.mrf.mxu0  ;;  %v417_v7 = vadd.f32 %v1848_v53, %v1810_v48 }
 0x111   : >> { %v411_v55 = vpop.f32.mrf.mxu1 }
 0x112   : >> { %v412_v11 = vadd.f32 %v411_v55, %v326_v50 }
 0x115   : >> { %v1883_v52 = vpop.f32.mrf.mxu0 }
 0x116   : >> { %v1921_v57 = vpop.f32.mrf.mxu1  ;;  %v527_v12 = vadd.f32 %v1883_v52, %v407_v6  ;;  %v1229_v52 = vshrl.u32 %v1228_v42, 7 }
 0x117   : >> { %v507_v54 = vpop.f32.mrf.mxu0 }
 0x118   : >> { %v620_v61 = vpop.f32.mrf.mxu1  ;;  %v526_v14 = vadd.f32 %v507_v54, %v402_v10  ;;  %v640_v18 = vadd.f32 %v1921_v57, %v527_v12 }
 0x11a   : >> { %v639_v21 = vadd.f32 %v620_v61, %v526_v14 }
 0x11b   : >> { %v1886_v56 = vpop.f32.mrf.mxu0 }
 0x11c   : >> { %v529_v13 = vadd.f32 %v1886_v56, %v417_v7 }
 0x11d   : >> { %v517_v59 = vpop.f32.mrf.mxu0 }
 0x11e   : >> { %v1924_v58 = vpop.f32.mrf.mxu1  ;;  %v528_v15 = vadd.f32 %v517_v59, %v412_v11 }
 0x11f   : >> { %v642_v19 = vadd.f32 %v1924_v58, %v529_v13 }
 0x120   : >> { %v630_v2 = vpop.f32.mrf.mxu1 }
 0x121   : >> { %v641_v23 = vadd.f32 %v630_v2, %v528_v15  ;;  %v1230_v2 = vsub.s32 %v1227_v51, %v1229_v52 }
 0x139   : >> { %v1959_v62 = vpop.f32.mrf.mxu0 }
 0x13a   : >> { %v1997_v60 = vpop.f32.mrf.mxu1  ;;  %v750_v25 = vadd.f32 %v1959_v62, %v640_v18 }
 0x13b   : >> { %v730_v63 = vpop.f32.mrf.mxu0 }
 0x13c   : >> { %v840_v4 = vpop.f32.mrf.mxu1  ;;  %v749_v22 = vadd.f32 %v730_v63, %v639_v21  ;;  %v860_v24 = vadd.f32 %v1997_v60, %v750_v25 }
 0x13e   : >> { %v859_v33 = vadd.f32 %v840_v4, %v749_v22 }
 0x13f   : >> { %v1962_v3 = vpop.f32.mrf.mxu0 }
 0x140   : >> { %v752_v26 = vadd.f32 %v1962_v3, %v642_v19 }
 0x141   : >> { %v740_v5 = vpop.f32.mrf.mxu0 }
 0x142   : >> { %v2000_v8 = vpop.f32.mrf.mxu1  ;;  %v751_v28 = vadd.f32 %v740_v5, %v641_v23 }
 0x143   : >> { %v862_v30 = vadd.f32 %v2000_v8, %v752_v26 }
 0x144   : >> { %v850_v16 = vpop.f32.mrf.mxu1 }
 0x145   : >> { %v861_v34 = vadd.f32 %v850_v16, %v751_v28 }
 0x15d   : >> { %v2035_v9 = vpop.f32.mrf.mxu0 }
 0x15e   : >> { %v2073_v20 = vpop.f32.mrf.mxu1  ;;  %v973_v35 = vadd.f32 %v2035_v9, %v860_v24 }
 0x15f   : >> { %v953_v17 = vpop.f32.mrf.mxu0 }
 0x160   : >> { %v1063_v29 = vpop.f32.mrf.mxu1  ;;  %v972_v37 = vadd.f32 %v953_v17, %v859_v33  ;;  %v1083_v43 = vadd.f32 %v2073_v20, %v973_v35 }
 0x162   : >> { %v1082_v47 = vadd.f32 %v1063_v29, %v972_v37 }
 0x163   : >> { %v2038_v27 = vpop.f32.mrf.mxu0 }
 0x164   : >> { %v975_v36 = vadd.f32 %v2038_v27, %v862_v30 }
 0x165   : >> { %v963_v31 = vpop.f32.mrf.mxu0 }
 0x166   : >> { %v2076_v32 = vpop.f32.mrf.mxu1  ;;  %v974_v38 = vadd.f32 %v963_v31, %v861_v34 }
 0x167   : >> { %v1085_v44 = vadd.f32 %v2076_v32, %v975_v36 }
 0x168   : >> { %v1073_v39 = vpop.f32.mrf.mxu1 }
 0x169   : >> { %v1084_v48 = vadd.f32 %v1073_v39, %v974_v38 }
 0x181   : >> { %v2111_v45 = vpop.f32.mrf.mxu0 }
 0x182   : >> { %v2114_v46 = vpop.f32.mrf.mxu1  ;;  %v1193_v49 = vadd.f32 %v2111_v45, %v1083_v43 }
 0x183   : >> { %v1195_v50 = vadd.f32 %v2114_v46, %v1085_v44  ;;  %v1173_v53 = vpop.f32.mrf.mxu0 }
 0x184   : >> { %v1183_v54 = vpop.f32.mrf.mxu1  ;;  %v1203_v55 = vmul.f32 %v2218_v0, %v1193_v49  ;;  %v1192_v57 = vadd.f32 %v1173_v53, %v1082_v47 }
 0x185   : >> { %v1205_v56 = vmul.f32 %v2218_v0, %v1195_v50  ;;  %v1194_v59 = vadd.f32 %v1183_v54, %v1084_v48 }
 0x186   : >> { %v1213_v61 = vadd.f32 %v2223_v1, %v1203_v55  ;;  %v1202_v58 = vmul.f32 %v2218_v0, %v1192_v57 }
 0x187   : >> { %v1215_v62 = vadd.f32 %v2223_v1, %v1205_v56  ;;  %v1204_v63 = vmul.f32 %v2218_v0, %v1194_v59 }
 0x188   : >> { %v1217_v60 = vmax.f32 %v1213_v61, 0.0  ;;  %v1212_v4 = vadd.f32 %v2223_v1, %v1202_v58 }
 0x189   : >> { %v1219_v3 = vmax.f32 %v1215_v62, 0.0  ;;  %v1214_v5 = vadd.f32 %v2223_v1, %v1204_v63 }
 0x18a   : >> { %v1216_v7 = vmax.f32 %v1212_v4, 0.0 }
 0x18b   : >> { %v1221_v6 = vmax.f32 %v1217_v60, %v1219_v3  ;;  %v1218_v8 = vmax.f32 %v1214_v5, 0.0 }
 0x18d   : >> { %v1241_v9 = vcombine.high %v1221_v6, %v1221_v6  ;;  %v1248_v10 = vrot.slane %v1221_v6, %v1230_v2  ;;  %v1220_v11 = vmax.f32 %v1216_v7, %v1218_v8 }
 0x18f   : >> { %v1255_v12 = vrot.slane %v1241_v9, %v1230_v2  ;;  %v1256_v13 = vcombine.high %v1248_v10, %v1248_v10  ;;  %v1295_v14 = vsel %vm1266_vm0, %v1248_v10, -inf  ;;  %v1224_v15 = vcombine.high %v1220_v11, %v1220_v11 }
 0x190   : >> { %v1296_v16 = vrot.slane %v1295_v14, 4  ;;  %v1231_v17 = vrot.slane %v1220_v11, %v1230_v2 }
 0x191   : >> { %v1257_v18 = vcombine.high %v1255_v12, %v1255_v12  ;;  %v1302_v19 = vsel %vm1266_vm0, %v1256_v13, -inf  ;;  %v1309_v20 = vsel %vm1266_vm0, %v1255_v12, -inf  ;;  %v1238_v21 = vrot.slane %v1224_v15, %v1230_v2 }
 0x192   : >> { %v1303_v23 = vrot.slane %v1302_v19, 4  ;;  %v1310_v25 = vrot.slane %v1309_v20, 4  ;;  %v1239_v26 = vcombine.high %v1231_v17, %v1231_v17  ;;  %v1267_v28 = vsel %vm1266_vm0, %v1231_v17, -inf }
 0x193   : >> { %v1316_v27 = vsel %vm1266_vm0, %v1257_v18, -inf  ;;  %v1240_v22 = vcombine.high %v1238_v21, %v1238_v21  ;;  %v1281_v29 = vsel %vm1266_vm0, %v1238_v21, -inf  ;;  %v1297_v24 = vmax.f32 %v1295_v14, %v1296_v16 }
 0x194   : >> { %v1304_v30 = vmax.f32 %v1302_v19, %v1303_v23  ;;  %v1317_v31 = vrot.slane %v1316_v27, 4  ;;  %v1268_v32 = vrot.slane %v1267_v28, 4  ;;  %v1274_v33 = vsel %vm1266_vm0, %v1239_v26, -inf }
 0x195   : >> { %v1282_v34 = vrot.slane %v1281_v29, 4  ;;  %v1288_v35 = vsel %vm1266_vm0, %v1240_v22, -inf  ;;  %v1311_v36 = vmax.f32 %v1309_v20, %v1310_v25  ;;  %v1275_v39 = vrot.slane %v1274_v33, 4 }
 0x196   : >> { %v1318_v37 = vmax.f32 %v1316_v27, %v1317_v31  ;;  %v1269_v38 = vmax.f32 %v1267_v28, %v1268_v32  ;;  %v1289_v41 = vrot.slane %v1288_v35, 4  ;;  %v1298_v42 = vrot.slane %v1297_v24, 2 }
 0x197   : >> { %v1283_v40 = vmax.f32 %v1281_v29, %v1282_v34  ;;  %v1305_v43 = vrot.slane %v1304_v30, 2  ;;  %v1276_v45 = vmax.f32 %v1274_v33, %v1275_v39  ;;  %v1312_v48 = vrot.slane %v1311_v36, 2 }
 0x198   : >> { %v1270_v44 = vrot.slane %v1269_v38, 2  ;;  %v1290_v47 = vmax.f32 %v1288_v35, %v1289_v41  ;;  %v1319_v49 = vrot.slane %v1318_v37, 2  ;;  %v1299_v54 = vmax.f32 %v1297_v24, %v1298_v42 }
 0x199   : >> { %v1284_v46 = vrot.slane %v1283_v40, 2  ;;  %v1277_v51 = vrot.slane %v1276_v45, 2  ;;  %v1306_v55 = vmax.f32 %v1304_v30, %v1305_v43  ;;  %v1313_v62 = vmax.f32 %v1311_v36, %v1312_v48 }
 0x19a   : >> { %v1271_v50 = vmax.f32 %v1269_v38, %v1270_v44  ;;  %v1291_v53 = vrot.slane %v1290_v47, 2  ;;  %v1320_v58 = vmax.f32 %v1318_v37, %v1319_v49  ;;  %v1300_v60 = vrot.slane %v1299_v54, 1 }
 0x19b   : >> { %v1285_v52 = vmax.f32 %v1283_v40, %v1284_v46  ;;  %v1278_v57 = vmax.f32 %v1276_v45, %v1277_v51  ;;  %v1307_v4 = vrot.slane %v1306_v55, 1  ;;  %v1314_v8 = vrot.slane %v1313_v62, 1 }
 0x19c   : >> { %v1272_v56 = vrot.slane %v1271_v50, 1  ;;  %v1292_v61 = vmax.f32 %v1290_v47, %v1291_v53  ;;  %v1321_v9 = vrot.slane %v1320_v58, 1  ;;  %v1301_v11 = vmax.f32 %v1299_v54, %v1300_v60 }
 0x19d   : >> { %v1286_v59 = vrot.slane %v1285_v52, 1  ;;  %v1279_v63 = vrot.slane %v1278_v57, 1  ;;  %v1308_v13 = vmax.f32 %v1306_v55, %v1307_v4  ;;  %v1315_v15 = vmax.f32 %v1313_v62, %v1314_v8 }
 0x19e   : >> { %v1293_v2 = vrot.slane %v1292_v61, 1  ;;  %v1273_v5 = vmax.f32 %v1271_v50, %v1272_v56  ;;  %v1322_v17 = vmax.f32 %v1320_v58, %v1321_v9 }
 0x19f   : >> { %v1287_v3 = vmax.f32 %v1285_v52, %v1286_v59  ;;  %v1280_v6 = vmax.f32 %v1278_v57, %v1279_v63 }
 0x1a0   : >> { %v1294_v7 = vmax.f32 %v1292_v61, %v1293_v2 }
 0x1a1   : >> { %v1332_v10 = vsel %vm1331_vm1, %v1280_v6, %v1273_v5 }
 0x1a2   : >> { %v1334_v12 = vsel %vm1333_vm2, %v1287_v3, %v1332_v10 }
 0x1a3   : >> { %v1336_v14 = vsel %vm1335_vm3, %v1294_v7, %v1334_v12 }
 0x1a4   : >> { %v1338_v16 = vsel %vm1337_vm4, %v1301_v11, %v1336_v14  ;;  %204 = sbr.rel (!%p202_p4) target bundleno = 15 (0xf), region = 85 }
 0x1a5   : >> { %v1340_v18 = vsel %vm1339_vm5, %v1308_v13, %v1338_v16 }
 0x1a6   : >> { %v1342_v19 = vsel %vm1341_vm6, %v1315_v15, %v1340_v18 }
 0x1a7   : >> { %v1344_v20 = vsel %vm1343_vm7, %v1322_v17, %v1342_v19 }
 0x1a8   : >> { %1348 = vst [vmem:[%s1347_s19] sm:$0xff] %v1344_v20 }
 0x1a9 PF: > { %s14_s15 = sadd.s32 1, %s2175_s15  }
 0x1aa   : > { %p11_p5 = scmp.ge.s32.totalorder %s14_s15, 4  }
 0x1ac   :  { %13 = sbr.rel (!%p11_p5) target bundleno = 1 (0x1), region = 96 }

// kernel: convnet_forward.3
= control target key start
LH: loop header
LB: loop body
LE: loop exit
PB: predicated region body
PF: predicated region fallthrough
CT: control target
= control target key end

     0   :  { %s2295_s15 = smov 0   ;;  %s2564_s0 = inlined_call_operand.vmem [shape: f32[2,34,34,8], index: 0, kind: input, shape index: {}]   ;;  %s2565_s1 = inlined_call_operand.vmem [shape: f32[9,8,128], index: 1, kind: input, shape index: {}]   ;;  %s2566_s2 = inlined_call_operand.vmem [shape: f32[1,128], index: 2, kind: input, shape index: {}]   ;;  %s2567_s3 = inlined_call_operand.vmem [shape: f32[1,128], index: 3, kind: input, shape index: {}]   ;;  %s2568_s4 = inlined_call_operand.vmem [shape: f32[2,16,16,128], index: 4, kind: output, shape index: {}]  }
   0x1 LB: > { %s1878_s16 = sadd.s32 4294967295, %s2263_s15   ;;  %p1882_p0 = scmp.ge.s32.totalorder %s2263_s15, 1  ;;  %s2263_s15 = sphi %s2295_s15, %s14_s15  }
   0x2   : > { %p162_p1 = scmp.lt.s32.totalorder %s2263_s15, 3 }
   0x4   : > { %p163_p2 = pnand %p1882_p0, %p162_p1 }
   0x5   : > { %p188_p3 = scmp.lt.s32.totalorder (!%p163_p2), %s1878_s16, 1  ;;  %s2323_s29 = smov (!%p163_p2), 0  }
   0x6   : > { %166 = sbr.rel (%p163_p2) target bundleno = 336 (0x150), region = 36 }
   0xb   : > { %v2306_v0 = vld [vmem:[%s2566_s2] ss:$0 sm:$0xff]  ;;  %s2570_s16 = smov (!%p188_p3, %s1878_s16), 1 }
   0xc   : > { %v2311_v1 = vld [vmem:[%s2567_s3] ss:$0 sm:$0xff]  ;;  %s2235_s21 = smul.u32 1360, %s2570_s16  ;;  %s2025_s22 = sshll.u32 %s2570_s16, 8 }
   0xd   : > { %s2316_s25 = scalar_lea.vmem %s2568_s4, %s2025_s22 }
   0xe   : > { %s2321_s28 = scalar_lea.vmem %s2564_s0, %s2235_s21 }
   0xf LB: >> { %v1888_v2 = vld [vmem:[%s2565_s1 + $0x8] sm:$0xff]  ;;  %v217_v3 = vld [vmem:[%s2565_s1] sm:$0xff]  ;;  %v1905_v4 = vld [vmem:[%s2565_s1 + $0x10] sm:$0xff]  ;;  %s1887_s10 = smul.u32 80, %s2267_s29  ;;  %vm228_vm0 = vcmask 64512   ;;  %vm1650_vm1 = vcmask 1041408   ;;  %s2267_s29 = sphi %s2323_s29, %s205_s29  }
  0x10   : >> { %2233 = vmatprep.subr.mxu1 %v1888_v2  ;;  %2107 = vmatprep.subr.mxu0 %v1888_v2  ;;  %v1924_v11 = vld [vmem:[%s2565_s1 + $0x18] sm:$0xff]  ;;  %v1941_v12 = vld [vmem:[%s2565_s1 + $0x20] sm:$0xff]  ;;  %v1958_v21 = vld [vmem:[%s2565_s1 + $0x28] sm:$0xff]  ;;  %vm1779_vm2 = vcmask 1041409   ;;  %vm1781_vm3 = vcmask 1042434   ;;  %vm1783_vm4 = vcmask 1043459  }
  0x11   : >> { %2234 = vmatpush3.msra.mxu1 %v1888_v2  ;;  %2108 = vmatpush3.msra.mxu0 %v1888_v2  ;;  %s2339_s11 = scalar_lea.vmem %s2321_s28, %s1887_s10  ;;  %v1977_v22 = vld [vmem:[%s2565_s1 + $0x30] sm:$0xff]  ;;  %v1994_v33 = vld [vmem:[%s2565_s1 + $0x38] sm:$0xff]  ;;  %v2011_v34 = vld [vmem:[%s2565_s1 + $0x40] sm:$0xff]  ;;  %vm1785_vm5 = vcmask 1044484   ;;  %vm1787_vm6 = vcmask 1045509   ;;  %vm1789_vm7 = vcmask 1046534  }
  0x12   : >> { %2121 = vmatprep.subr.mxu1 %v217_v3  ;;  %2135 = vmatprep.subr.mxu0 %v1905_v4  ;;  %v218_v5 = vld [vmem:[%s2339_s11 + $0x1] sm:$0xff]  ;;  %v222_v6 = vld [vmem:[%s2339_s11 + $0x29] sm:$0xff]  ;;  %v223_v8 = vld [vmem:[%s2339_s11 + $0x31] sm:$0xff]  ;;  %vm1791_vm8 = vcmask 1047559   ;;  %s2022_s26 = sshll.u32 %s2267_s29, 4  ;;  %s205_s29 = sadd.s32 1, %s2267_s29  }
  0x13   : >> { %v219_v7 = vld [vmem:[%s2339_s11 + $0x9] sm:$0xff]  ;;  %2109 = vmatprep.mubr.msk.f32.mxu0 %vm228_vm0, %v218_v5  ;;  %2115 = vmatprep.mubr.msk.f32.mxu1 %vm228_vm0, %v222_v6  ;;  %v220_v9 = vld [vmem:[%s2339_s11 + $0x11] sm:$0xff]  ;;  %v224_v10 = vld [vmem:[%s2339_s11 + $0x39] sm:$0xff]  ;;  %s2541_s27 = scalar_lea.vmem %s2316_s25, %s2022_s26  ;;  %p202_p4 = scmp.ge.s32.totalorder %s205_s29, 16  }
  0x14   : >> { %2110 = vmatmul.mubr.msk.f32.vlgmr.msra.gmra.mxu0 %vm228_vm0, %v219_v7  ;;  %2116 = vmatmul.mubr.msk.f32.vlgmr.msra.gmra.mxu1 %vm228_vm0, %v223_v8  ;;  %v221_v13 = vld [vmem:[%s2339_s11 + $0x19] sm:$0xff]  ;;  %v225_v14 = vld [vmem:[%s2339_s11 + $0x41] sm:$0xff]  ;;  %v488_v18 = vld [vmem:[%s2339_s11 + $0xa] sm:$0xff] }
  0x15   : >> { %2122 = vmatpush3.msra.mxu1 %v217_v3  ;;  %2136 = vmatpush3.msra.mxu0 %v1905_v4  ;;  %v209_v15 = vld [vmem:[%s2339_s11] sm:$0xff]  ;;  %v210_v17 = vld [vmem:[%s2339_s11 + $0x8] sm:$0xff]  ;;  %v211_v19 = vld [vmem:[%s2339_s11 + $0x10] sm:$0xff] }
  0x16   : >> { %2112 = vmatprep.mubr.msk.f32.mxu0 %vm228_vm0, %v220_v9  ;;  %2118 = vmatprep.mubr.msk.f32.mxu1 %vm228_vm0, %v224_v10  ;;  %v487_v16 = vld [vmem:[%s2339_s11 + $0x2] sm:$0xff]  ;;  %v489_v20 = vld [vmem:[%s2339_s11 + $0x12] sm:$0xff]  ;;  %v490_v24 = vld [vmem:[%s2339_s11 + $0x1a] sm:$0xff] }
  0x17   : >> { %2149 = vmatprep.subr.mxu1 %v1924_v11  ;;  %2163 = vmatprep.subr.mxu0 %v1941_v12  ;;  %v212_v23 = vld [vmem:[%s2339_s11 + $0x18] sm:$0xff]  ;;  %v213_v25 = vld [vmem:[%s2339_s11 + $0x28] sm:$0xff]  ;;  %v214_v27 = vld [vmem:[%s2339_s11 + $0x30] sm:$0xff] }
  0x18   : >> { %2113 = vmatmul.mubr.msk.f32.gmra.mxu0 %vm228_vm0, %v221_v13  ;;  %2119 = vmatmul.mubr.msk.f32.gmra.mxu1 %vm228_vm0, %v225_v14  ;;  %v491_v26 = vld [vmem:[%s2339_s11 + $0x2a] sm:$0xff]  ;;  %v492_v28 = vld [vmem:[%s2339_s11 + $0x32] sm:$0xff]  ;;  %v493_v30 = vld [vmem:[%s2339_s11 + $0x3a] sm:$0xff] }
  0x19   : >> { %2123 = vmatprep.mubr.msk.f32.mxu1 %vm228_vm0, %v209_v15  ;;  %2137 = vmatprep.mubr.msk.f32.mxu0 %vm228_vm0, %v487_v16  ;;  %v215_v29 = vld [vmem:[%s2339_s11 + $0x38] sm:$0xff]  ;;  %v216_v31 = vld [vmem:[%s2339_s11 + $0x40] sm:$0xff]  ;;  %v1920_v35 = vld [vmem:[%s2339_s11 + $0x50] sm:$0xff] }
  0x1a   : >> { %v494_v32 = vld [vmem:[%s2339_s11 + $0x42] sm:$0xff]  ;;  %v1937_v36 = vld [vmem:[%s2339_s11 + $0x51] sm:$0xff]  ;;  %v1938_v38 = vld [vmem:[%s2339_s11 + $0x59] sm:$0xff] }
  0x1b   : >> { %v1921_v37 = vld [vmem:[%s2339_s11 + $0x58] sm:$0xff]  ;;  %v1922_v39 = vld [vmem:[%s2339_s11 + $0x60] sm:$0xff]  ;;  %v1923_v41 = vld [vmem:[%s2339_s11 + $0x68] sm:$0xff] }
  0x1c   : >> { %2124 = vmatmul.mubr.msk.f32.vlgmr.msra.gmra.mxu1 %vm228_vm0, %v210_v17  ;;  %2138 = vmatmul.mubr.msk.f32.vlgmr.msra.gmra.mxu0 %vm228_vm0, %v488_v18  ;;  %v1939_v40 = vld [vmem:[%s2339_s11 + $0x61] sm:$0xff]  ;;  %v1940_v42 = vld [vmem:[%s2339_s11 + $0x69] sm:$0xff]  ;;  %v1954_v43 = vld [vmem:[%s2339_s11 + $0x52] sm:$0xff] }
  0x1d   : >> { %2150 = vmatpush3.msra.mxu1 %v1924_v11  ;;  %2164 = vmatpush3.msra.mxu0 %v1941_v12  ;;  %v1973_v44 = vld [vmem:[%s2339_s11 + $0x78] sm:$0xff]  ;;  %v1974_v46 = vld [vmem:[%s2339_s11 + $0x80] sm:$0xff]  ;;  %v1975_v48 = vld [vmem:[%s2339_s11 + $0x88] sm:$0xff] }
  0x1e   : >> { %2126 = vmatprep.mubr.msk.f32.mxu1 %vm228_vm0, %v211_v19  ;;  %2140 = vmatprep.mubr.msk.f32.mxu0 %vm228_vm0, %v489_v20  ;;  %v1955_v45 = vld [vmem:[%s2339_s11 + $0x5a] sm:$0xff]  ;;  %v1956_v47 = vld [vmem:[%s2339_s11 + $0x62] sm:$0xff]  ;;  %v1957_v49 = vld [vmem:[%s2339_s11 + $0x6a] sm:$0xff] }
  0x1f   : >> { %2177 = vmatprep.subr.mxu1 %v1958_v21  ;;  %2191 = vmatprep.subr.mxu0 %v1977_v22  ;;  %v1976_v50 = vld [vmem:[%s2339_s11 + $0x90] sm:$0xff]  ;;  %v1990_v51 = vld [vmem:[%s2339_s11 + $0x79] sm:$0xff]  ;;  %v1991_v53 = vld [vmem:[%s2339_s11 + $0x81] sm:$0xff] }
  0x20   : >> { %2127 = vmatmul.mubr.msk.f32.gmra.mxu1 %vm228_vm0, %v212_v23  ;;  %2141 = vmatmul.mubr.msk.f32.gmra.mxu0 %vm228_vm0, %v490_v24  ;;  %v2007_v52 = vld [vmem:[%s2339_s11 + $0x7a] sm:$0xff]  ;;  %v2008_v54 = vld [vmem:[%s2339_s11 + $0x82] sm:$0xff]  ;;  %v2009_v56 = vld [vmem:[%s2339_s11 + $0x8a] sm:$0xff] }
  0x21   : >> { %2129 = vmatprep.mubr.msk.f32.mxu1 %vm228_vm0, %v213_v25  ;;  %2143 = vmatprep.mubr.msk.f32.mxu0 %vm228_vm0, %v491_v26  ;;  %v1992_v55 = vld [vmem:[%s2339_s11 + $0x89] sm:$0xff]  ;;  %v1993_v57 = vld [vmem:[%s2339_s11 + $0x91] sm:$0xff] }
  0x22   : >> { %v2010_v58 = vld [vmem:[%s2339_s11 + $0x92] sm:$0xff] }
  0x24   : >> { %2130 = vmatmul.mubr.msk.f32.gmra.mxu1 %vm228_vm0, %v214_v27  ;;  %2144 = vmatmul.mubr.msk.f32.gmra.mxu0 %vm228_vm0, %v492_v28 }
  0x25   : >> { %2132 = vmatprep.mubr.msk.f32.mxu1 %vm228_vm0, %v215_v29  ;;  %2146 = vmatprep.mubr.msk.f32.mxu0 %vm228_vm0, %v493_v30 }
  0x28   : >> { %2133 = vmatmul.mubr.msk.f32.gmra.mxu1 %vm228_vm0, %v216_v31  ;;  %2147 = vmatmul.mubr.msk.f32.gmra.mxu0 %vm228_vm0, %v494_v32 }
  0x29   : >> { %2151 = vmatprep.mubr.msk.f32.mxu1 %vm228_vm0, %v213_v25  ;;  %2165 = vmatprep.mubr.msk.f32.mxu0 %vm228_vm0, %v222_v6 }
  0x2c   : >> { %2152 = vmatmul.mubr.msk.f32.vlgmr.msra.gmra.mxu1 %vm228_vm0, %v214_v27  ;;  %2166 = vmatmul.mubr.msk.f32.vlgmr.msra.gmra.mxu0 %vm228_vm0, %v223_v8 }
  0x2d   : >> { %2178 = vmatpush3.msra.mxu1 %v1958_v21  ;;  %2192 = vmatpush3.msra.mxu0 %v1977_v22 }
  0x2e   : >> { %2154 = vmatprep.mubr.msk.f32.mxu1 %vm228_vm0, %v215_v29  ;;  %2168 = vmatprep.mubr.msk.f32.mxu0 %vm228_vm0, %v224_v10 }
  0x2f   : >> { %2205 = vmatprep.subr.mxu1 %v1994_v33  ;;  %2219 = vmatprep.subr.mxu0 %v2011_v34 }
  0x30   : >> { %2155 = vmatmul.mubr.msk.f32.gmra.mxu1 %vm228_vm0, %v216_v31  ;;  %2169 = vmatmul.mubr.msk.f32.gmra.mxu0 %vm228_vm0, %v225_v14 }
  0x31   : >> { %2157 = vmatprep.mubr.msk.f32.mxu1 %vm228_vm0, %v1920_v35  ;;  %2171 = vmatprep.mubr.msk.f32.mxu0 %vm228_vm0, %v1937_v36 }
  0x34   : >> { %2158 = vmatmul.mubr.msk.f32.gmra.mxu1 %vm228_vm0, %v1921_v37  ;;  %2172 = vmatmul.mubr.msk.f32.gmra.mxu0 %vm228_vm0, %v1938_v38 }
  0x35   : >> { %2160 = vmatprep.mubr.msk.f32.mxu1 %vm228_vm0, %v1922_v39  ;;  %2174 = vmatprep.mubr.msk.f32.mxu0 %vm228_vm0, %v1939_v40 }
  0x38   : >> { %2161 = vmatmul.mubr.msk.f32.gmra.mxu1 %vm228_vm0, %v1923_v41  ;;  %2175 = vmatmul.mubr.msk.f32.gmra.mxu0 %vm228_vm0, %v1940_v42 }
  0x39   : >> { %2179 = vmatprep.mubr.msk.f32.mxu1 %vm228_vm0, %v491_v26  ;;  %2193 = vmatprep.mubr.msk.f32.mxu0 %vm228_vm0, %v1920_v35 }
  0x3c   : >> { %2180 = vmatmul.mubr.msk.f32.vlgmr.msra.gmra.mxu1 %vm228_vm0, %v492_v28  ;;  %2194 = vmatmul.mubr.msk.f32.vlgmr.msra.gmra.mxu0 %vm228_vm0, %v1921_v37 }
  0x3d   : >> { %2206 = vmatpush3.msra.mxu1 %v1994_v33  ;;  %2220 = vmatpush3.msra.mxu0 %v2011_v34 }
  0x3e   : >> { %2182 = vmatprep.mubr.msk.f32.mxu1 %vm228_vm0, %v493_v30  ;;  %2196 = vmatprep.mubr.msk.f32.mxu0 %vm228_vm0, %v1922_v39 }
  0x40   : >> { %2183 = vmatmul.mubr.msk.f32.gmra.mxu1 %vm228_vm0, %v494_v32  ;;  %2197 = vmatmul.mubr.msk.f32.gmra.mxu0 %vm228_vm0, %v1923_v41 }
  0x41   : >> { %2185 = vmatprep.mubr.msk.f32.mxu1 %vm228_vm0, %v1954_v43  ;;  %2199 = vmatprep.mubr.msk.f32.mxu0 %vm228_vm0, %v1973_v44 }
  0x44   : >> { %2186 = vmatmul.mubr.msk.f32.gmra.mxu1 %vm228_vm0, %v1955_v45  ;;  %2200 = vmatmul.mubr.msk.f32.gmra.mxu0 %vm228_vm0, %v1974_v46 }
  0x45   : >> { %2188 = vmatprep.mubr.msk.f32.mxu1 %vm228_vm0, %v1956_v47  ;;  %2202 = vmatprep.mubr.msk.f32.mxu0 %vm228_vm0, %v1975_v48 }
  0x48   : >> { %2189 = vmatmul.mubr.msk.f32.gmra.mxu1 %vm228_vm0, %v1957_v49  ;;  %2203 = vmatmul.mubr.msk.f32.gmra.mxu0 %vm228_vm0, %v1976_v50 }
  0x49   : >> { %2207 = vmatprep.mubr.msk.f32.mxu1 %vm228_vm0, %v1937_v36  ;;  %2221 = vmatprep.mubr.msk.f32.mxu0 %vm228_vm0, %v1954_v43 }
  0x4c   : >> { %2208 = vmatmul.mubr.msk.f32.vlgmr.msra.gmra.mxu1 %vm228_vm0, %v1938_v38  ;;  %2222 = vmatmul.mubr.msk.f32.vlgmr.msra.gmra.mxu0 %vm228_vm0, %v1955_v45 }
  0x4d   : >> { %2210 = vmatprep.mubr.msk.f32.mxu1 %vm228_vm0, %v1939_v40  ;;  %2224 = vmatprep.mubr.msk.f32.mxu0 %vm228_vm0, %v1956_v47 }
  0x50   : >> { %2211 = vmatmul.mubr.msk.f32.gmra.mxu1 %vm228_vm0, %v1940_v42  ;;  %2225 = vmatmul.mubr.msk.f32.gmra.mxu0 %vm228_vm0, %v1957_v49 }
  0x51   : >> { %2213 = vmatprep.mubr.msk.f32.mxu1 %vm228_vm0, %v1990_v51  ;;  %2227 = vmatprep.mubr.msk.f32.mxu0 %vm228_vm0, %v2007_v52 }
  0x54   : >> { %2214 = vmatmul.mubr.msk.f32.gmra.mxu1 %vm228_vm0, %v1991_v53  ;;  %2228 = vmatmul.mubr.msk.f32.gmra.mxu0 %vm228_vm0, %v2008_v54 }
  0x55   : >> { %2216 = vmatprep.mubr.msk.f32.mxu1 %vm228_vm0, %v1992_v55  ;;  %2230 = vmatprep.mubr.msk.f32.mxu0 %vm228_vm0, %v2009_v56 }
  0x58   : >> { %2217 = vmatmul.mubr.msk.f32.gmra.mxu1 %vm228_vm0, %v1993_v57  ;;  %2231 = vmatmul.mubr.msk.f32.gmra.mxu0 %vm228_vm0, %v2010_v58 }
  0xd4   : >> { %v2111_v59 = vpop.f32.mrf.mxu0  ;;  %v2117_v60 = vpop.f32.mrf.mxu1 }
  0xd6   : >> { %v319_v61 = vpop.f32.mrf.mxu0  ;;  %v339_v62 = vpop.f32.mrf.mxu1 }
  0xd8   : >> { %v2114_v63 = vpop.f32.mrf.mxu0  ;;  %v2120_v2 = vpop.f32.mrf.mxu1 }
  0xda   : >> { %v329_v3 = vpop.f32.mrf.mxu0  ;;  %v2479_v4 = vpop.f32.mrf.mxu1 }
  0xdc   : >> { %v2125_v5 = vpop.f32.mrf.mxu1  ;;  %v2139_v6 = vpop.f32.mrf.mxu0 }
  0xdd   : >> { %v454_v39 = vadd.f32 %v2125_v5, %v2111_v59 }
  0xde   : >> { %v448_v7 = vpop.f32.mrf.mxu1  ;;  %v587_v8 = vpop.f32.mrf.mxu0 }
  0xdf   : >> { %v449_v42 = vadd.f32 %v448_v7, %v319_v61  ;;  %v627_v45 = vadd.f32 %v2139_v6, %v454_v39 }
  0xe0   : >> { %v2128_v9 = vpop.f32.mrf.mxu1  ;;  %v2142_v10 = vpop.f32.mrf.mxu0 }
  0xe1   : >> { %v464_v11 = vadd.f32 %v2128_v9, %v2114_v63  ;;  %v626_v48 = vadd.f32 %v587_v8, %v449_v42 }
  0xe2   : >> { %v458_v12 = vpop.f32.mrf.mxu1  ;;  %v597_v13 = vpop.f32.mrf.mxu0 }
  0xe3   : >> { %v629_v14 = vadd.f32 %v2142_v10, %v464_v11  ;;  %v459_v56 = vadd.f32 %v458_v12, %v329_v3 }
  0xe4   : >> { %v2131_v15 = vpop.f32.mrf.mxu1  ;;  %v2145_v16 = vpop.f32.mrf.mxu0 }
  0xe5   : >> { %v474_v53 = vadd.f32 %v2131_v15, %v2117_v60  ;;  %v628_v8 = vadd.f32 %v597_v13, %v459_v56 }
  0xe6   : >> { %v468_v17 = vpop.f32.mrf.mxu1  ;;  %v607_v18 = vpop.f32.mrf.mxu0 }
  0xe7   : >> { %v469_v57 = vadd.f32 %v468_v17, %v339_v62  ;;  %v631_v9 = vadd.f32 %v2145_v16, %v474_v53 }
  0xe8   : >> { %v2134_v19 = vpop.f32.mrf.mxu1  ;;  %v2148_v20 = vpop.f32.mrf.mxu0 }
  0xe9   : >> { %v484_v61 = vadd.f32 %v2134_v19, %v2120_v2 }
  0xea   : >> { %v478_v21 = vpop.f32.mrf.mxu1  ;;  %v2481_v22 = vpop.f32.mrf.mxu0 }
  0xeb   : >> { %v479_v60 = vadd.f32 %v478_v21, %v2479_v4  ;;  %v633_v62 = vadd.f32 %v2148_v20, %v484_v61 }
  0xec   : >> { %v2153_v23 = vpop.f32.mrf.mxu1  ;;  %v2167_v24 = vpop.f32.mrf.mxu0 }
  0xed   : >> { %v777_v49 = vadd.f32 %v2153_v23, %v627_v45  ;;  %v630_v23 = vadd.f32 %v607_v18, %v469_v57 }
  0xee   : >> { %v737_v25 = vpop.f32.mrf.mxu1  ;;  %v884_v26 = vpop.f32.mrf.mxu0 }
  0xef   : >> { %v776_v52 = vadd.f32 %v737_v25, %v626_v48  ;;  %v924_v59 = vadd.f32 %v2167_v24, %v777_v49 }
  0xf0   : >> { %v2156_v27 = vpop.f32.mrf.mxu1  ;;  %v2170_v28 = vpop.f32.mrf.mxu0 }
  0xf1   : >> { %v779_v58 = vadd.f32 %v2156_v27, %v629_v14  ;;  %v923_v7 = vadd.f32 %v884_v26, %v776_v52  ;;  %v632_v27 = vadd.f32 %v2481_v22, %v479_v60 }
  0xf2   : >> { %v747_v29 = vpop.f32.mrf.mxu1  ;;  %v894_v30 = vpop.f32.mrf.mxu0 }
  0xf3   : >> { %v926_v39 = vadd.f32 %v2170_v28, %v779_v58  ;;  %v778_v12 = vadd.f32 %v747_v29, %v628_v8 }
  0xf4   : >> { %v2159_v31 = vpop.f32.mrf.mxu1  ;;  %v2173_v32 = vpop.f32.mrf.mxu0 }
  0xf5   : >> { %v781_v15 = vadd.f32 %v2159_v31, %v631_v9 }
  0xf6   : >> { %v757_v33 = vpop.f32.mrf.mxu1  ;;  %v904_v34 = vpop.f32.mrf.mxu0 }
  0xf7   : >> { %v780_v14 = vadd.f32 %v757_v33, %v630_v23  ;;  %v928_v13 = vadd.f32 %v2173_v32, %v781_v15 }
  0xf8   : >> { %v2162_v35 = vpop.f32.mrf.mxu1  ;;  %v2176_v36 = vpop.f32.mrf.mxu0 }
  0xf9   : >> { %v783_v16 = vadd.f32 %v2162_v35, %v633_v62  ;;  %v927_v4 = vadd.f32 %v904_v34, %v780_v14 }
  0xfa   : >> { %v767_v37 = vpop.f32.mrf.mxu1  ;;  %v2483_v38 = vpop.f32.mrf.mxu0 }
  0xfb   : >> { %v782_v45 = vadd.f32 %v767_v37, %v632_v27 }
  0xfc   : >> { %v2181_v40 = vpop.f32.mrf.mxu1  ;;  %v2195_v41 = vpop.f32.mrf.mxu0 }
  0xfd   : >> { %v1071_v6 = vadd.f32 %v2181_v40, %v924_v59  ;;  %v929_v53 = vadd.f32 %v2483_v38, %v782_v45 }
  0xfe   : >> { %v1031_v43 = vpop.f32.mrf.mxu1  ;;  %v1181_v44 = vpop.f32.mrf.mxu0 }
  0xff   : >> { %v1070_v42 = vadd.f32 %v1031_v43, %v923_v7  ;;  %v1221_v24 = vadd.f32 %v2195_v41, %v1071_v6  ;;  %v925_v43 = vadd.f32 %v894_v30, %v778_v12 }
 0x100   : >> { %v2184_v46 = vpop.f32.mrf.mxu1  ;;  %v2198_v47 = vpop.f32.mrf.mxu0 }
 0x101   : >> { %v1073_v17 = vadd.f32 %v2184_v46, %v926_v39  ;;  %v1220_v26 = vadd.f32 %v1181_v44, %v1070_v42  ;;  %v930_v46 = vadd.f32 %v2176_v36, %v783_v16 }
 0x102   : >> { %v1041_v50 = vpop.f32.mrf.mxu1  ;;  %v1191_v51 = vpop.f32.mrf.mxu0 }
 0x103   : >> { %v1223_v21 = vadd.f32 %v2198_v47, %v1073_v17  ;;  %v1072_v41 = vadd.f32 %v1041_v50, %v925_v43 }
 0x104   : >> { %v2187_v54 = vpop.f32.mrf.mxu1  ;;  %v2201_v55 = vpop.f32.mrf.mxu0 }
 0x105   : >> { %v1075_v20 = vadd.f32 %v2187_v54, %v928_v13  ;;  %v1222_v47 = vadd.f32 %v1191_v51, %v1072_v41  ;;  %v2269_v54 = vmov 1983009808  }
 0x106   : >> { %v1051_v63 = vpop.f32.mrf.mxu1  ;;  %v1201_v5 = vpop.f32.mrf.mxu0  ;;  %v1568_v58 = vunpack.c.l.s4 %v2269_v54 }
 0x107   : >> { %v1074_v48 = vadd.f32 %v1051_v63, %v927_v4  ;;  %v1225_v56 = vadd.f32 %v2201_v55, %v1075_v20  ;;  %v1570_v63 = vlaneseq }
 0x108   : >> { %v2190_v10 = vpop.f32.mrf.mxu1  ;;  %v2204_v11 = vpop.f32.mrf.mxu0 }
 0x109   : >> { %v1077_v22 = vadd.f32 %v2190_v10, %v930_v46  ;;  %v1224_v57 = vadd.f32 %v1201_v5, %v1074_v48  ;;  %v1569_v5 = vunpack.c.0.s8 %v1568_v58 }
 0x10a   : >> { %v1061_v25 = vpop.f32.mrf.mxu1  ;;  %v1211_v3 = vpop.f32.mrf.mxu0 }
 0x10b   : >> { %v1076_v59 = vadd.f32 %v1061_v25, %v929_v53  ;;  %v1227_v9 = vadd.f32 %v2204_v11, %v1077_v22  ;;  %v1571_v25 = vshrl.u32 %v1570_v63, 7 }
 0x10c   : >> { %v2209_v2 = vpop.f32.mrf.mxu1  ;;  %v2223_v19 = vpop.f32.mrf.mxu0 }
 0x10d   : >> { %v1368_v18 = vadd.f32 %v2209_v2, %v1221_v24  ;;  %v1226_v42 = vadd.f32 %v1211_v3, %v1076_v59 }
 0x10e   : >> { %v1328_v28 = vpop.f32.mrf.mxu1  ;;  %v1475_v40 = vpop.f32.mrf.mxu0 }
 0x10f   : >> { %v1367_v31 = vadd.f32 %v1328_v28, %v1220_v26  ;;  %v1515_v35 = vadd.f32 %v2223_v19, %v1368_v18  ;;  %v2499_v18 = vsub.s32 %v1569_v5, %v1571_v25 }
 0x110   : >> { %v2212_v29 = vpop.f32.mrf.mxu1  ;;  %v2226_v33 = vpop.f32.mrf.mxu0 }
 0x111   : >> { %v1370_v49 = vadd.f32 %v2212_v29, %v1223_v21  ;;  %v1514_v32 = vadd.f32 %v1475_v40, %v1367_v31  ;;  %v1529_v36 = vmul.f32 %v2306_v0, %v1515_v35 }
 0x112   : >> { %v1338_v44 = vpop.f32.mrf.mxu1  ;;  %v1485_v52 = vpop.f32.mrf.mxu0 }
 0x113   : >> { %v1517_v37 = vadd.f32 %v2226_v33, %v1370_v49  ;;  %v1528_v6 = vmul.f32 %v2306_v0, %v1514_v32  ;;  %v1369_v10 = vadd.f32 %v1338_v44, %v1222_v47  ;;  %v1543_v60 = vadd.f32 %v2311_v1, %v1529_v36 }
 0x114   : >> { %v2215_v30 = vpop.f32.mrf.mxu1  ;;  %v2229_v34 = vpop.f32.mrf.mxu0 }
 0x115   : >> { %v1372_v50 = vadd.f32 %v2215_v30, %v1225_v56  ;;  %v1531_v51 = vmul.f32 %v2306_v0, %v1517_v37  ;;  %v1542_v11 = vadd.f32 %v2311_v1, %v1528_v6  ;;  %v1516_v14 = vadd.f32 %v1485_v52, %v1369_v10 }
 0x116   : >> { %v1348_v61 = vpop.f32.mrf.mxu1  ;;  %v1495_v7 = vpop.f32.mrf.mxu0  ;;  %v1551_v27 = vmax.f32 %v1543_v60, 0.0 }
 0x117   : >> { %v1371_v38 = vadd.f32 %v1348_v61, %v1224_v57  ;;  %v1519_v55 = vadd.f32 %v2229_v34, %v1372_v50  ;;  %v1545_v16 = vadd.f32 %v2311_v1, %v1531_v51  ;;  %v1550_v28 = vmax.f32 %v1542_v11, 0.0 }
 0x118   : >> { %v2218_v8 = vpop.f32.mrf.mxu1  ;;  %v2232_v62 = vpop.f32.mrf.mxu0  ;;  %v1530_v40 = vmul.f32 %v2306_v0, %v1516_v14 }
 0x119   : >> { %v1518_v23 = vadd.f32 %v1495_v7, %v1371_v38  ;;  %v1374_v39 = vadd.f32 %v2218_v8, %v1227_v9  ;;  %v1533_v15 = vmul.f32 %v2306_v0, %v1519_v55  ;;  %v1553_v20 = vmax.f32 %v1545_v16, 0.0 }
 0x11a   : >> { %v1358_v12 = vpop.f32.mrf.mxu1  ;;  %v1505_v21 = vpop.f32.mrf.mxu0  ;;  %v2505_v48 = vadd.f32 %v2311_v1, %v1530_v40 }
 0x11b   : >> { %v1532_v17 = vmul.f32 %v2306_v0, %v1518_v23  ;;  %v1521_v24 = vadd.f32 %v2232_v62, %v1374_v39  ;;  %v1547_v2 = vadd.f32 %v2311_v1, %v1533_v15  ;;  %v1373_v19 = vadd.f32 %v1358_v12, %v1226_v42 }
 0x11d   : >> { %v1546_v3 = vadd.f32 %v2311_v1, %v1532_v17  ;;  %v1535_v26 = vmul.f32 %v2306_v0, %v1521_v24  ;;  %v1555_v13 = vmax.f32 %v1547_v2, 0.0  ;;  %v1520_v45 = vadd.f32 %v1505_v21, %v1373_v19 }
 0x11f   : >> { %v1554_v43 = vmax.f32 %v1546_v3, 0.0  ;;  %v1549_v4 = vadd.f32 %v2311_v1, %v1535_v26  ;;  %v1559_v31 = vmax.f32 %v1551_v27, %v1555_v13  ;;  %v1534_v53 = vmul.f32 %v2306_v0, %v1520_v45 }
 0x121   : >> { %v1558_v29 = vmax.f32 %v1550_v28, %v1554_v43  ;;  %v1557_v33 = vmax.f32 %v1549_v4, 0.0  ;;  %v1583_v46 = vcombine.high %v1559_v31, %v1559_v31  ;;  %v1590_v41 = vrot.slane %v1559_v31, %v2499_v18 }
 0x122   : >> { %v1548_v25 = vadd.f32 %v2311_v1, %v1534_v53  ;;  %v1552_v28 = vmax.f32 %v2505_v48, 0.0 }
 0x123   : >> { %v1566_v49 = vcombine.high %v1558_v29, %v1558_v29  ;;  %v1573_v35 = vrot.slane %v1558_v29, %v2499_v18  ;;  %v2508_v44 = vmax.f32 %v1553_v20, %v1557_v33  ;;  %v1597_v52 = vrot.slane %v1583_v46, %v2499_v18 }
 0x124   : >> { %v1598_v22 = vcombine.high %v1590_v41, %v1590_v41  ;;  %v1679_v32 = vsel %vm1650_vm1, %v1590_v41, -inf  ;;  %v1556_v13 = vmax.f32 %v1548_v25, 0.0 }
 0x125   : >> { %v1680_v56 = vrot.slane %v1679_v32, 4  ;;  %v1580_v30 = vrot.slane %v1566_v49, %v2499_v18  ;;  %v1581_v34 = vcombine.high %v1573_v35, %v1573_v35  ;;  %v1651_v47 = vsel %vm1650_vm1, %v1573_v35, -inf }
 0x126   : >> { %v1599_v57 = vcombine.high %v1597_v52, %v1597_v52  ;;  %v1686_v37 = vsel %vm1650_vm1, %v1598_v22, -inf  ;;  %v1693_v54 = vsel %vm1650_vm1, %v1597_v52, -inf  ;;  %v1652_v58 = vrot.slane %v1651_v47, 4 }
 0x127   : >> { %v1681_v59 = vmax.f32 %v1679_v32, %v1680_v56  ;;  %v1687_v36 = vrot.slane %v1686_v37, 4  ;;  %v1694_v50 = vrot.slane %v1693_v54, 4  ;;  %v1582_v63 = vcombine.high %v1580_v30, %v1580_v30 }
 0x128   : >> { %v1700_v61 = vsel %vm1650_vm1, %v1599_v57, -inf  ;;  %v1653_v7 = vmax.f32 %v1651_v47, %v1652_v58  ;;  %v1658_v9 = vsel %vm1650_vm1, %v1581_v34, -inf  ;;  %v1665_v6 = vsel %vm1650_vm1, %v1580_v30, -inf }
 0x129   : >> { %v1682_v10 = vrot.slane %v1681_v59, 2  ;;  %v1688_v38 = vmax.f32 %v1686_v37, %v1687_v36  ;;  %v1695_v55 = vmax.f32 %v1693_v54, %v1694_v50  ;;  %v1701_v8 = vrot.slane %v1700_v61, 4 }
 0x12a   : >> { %v1654_v51 = vrot.slane %v1653_v7, 2  ;;  %v1659_v5 = vrot.slane %v1658_v9, 4  ;;  %v1666_v23 = vrot.slane %v1665_v6, 4  ;;  %v1672_v39 = vsel %vm1650_vm1, %v1582_v63, -inf }
 0x12b   : >> { %v1689_v42 = vrot.slane %v1688_v38, 2  ;;  %v1696_v60 = vrot.slane %v1695_v55, 2  ;;  %v1702_v15 = vmax.f32 %v1700_v61, %v1701_v8  ;;  %v1673_v14 = vrot.slane %v1672_v39, 4 }
 0x12c   : >> { %v1655_v62 = vmax.f32 %v1653_v7, %v1654_v51  ;;  %v1660_v12 = vmax.f32 %v1658_v9, %v1659_v5  ;;  %v1667_v11 = vmax.f32 %v1665_v6, %v1666_v23  ;;  %v1683_v17 = vmax.f32 %v1681_v59, %v1682_v10 }
 0x12d   : >> { %v1690_v24 = vmax.f32 %v1688_v38, %v1689_v42  ;;  %v1703_v2 = vrot.slane %v1702_v15, 2  ;;  %v1674_v3 = vmax.f32 %v1672_v39, %v1673_v14  ;;  %v1697_v26 = vmax.f32 %v1695_v55, %v1696_v60 }
 0x12e   : >> { %v1661_v19 = vrot.slane %v1660_v12, 2  ;;  %v1668_v16 = vrot.slane %v1667_v11, 2  ;;  %v1656_v27 = vrot.slane %v1655_v62, 1  ;;  %v1684_v21 = vrot.slane %v1683_v17, 1 }
 0x12f   : >> { %v1675_v4 = vrot.slane %v1674_v3, 2  ;;  %v1691_v31 = vrot.slane %v1690_v24, 1  ;;  %v1704_v45 = vmax.f32 %v1702_v15, %v1703_v2  ;;  %v1617_v20 = vcombine.high %v2508_v44, %v2508_v44 }
 0x130   : >> { %v1662_v40 = vmax.f32 %v1660_v12, %v1661_v19  ;;  %v1669_v43 = vmax.f32 %v1667_v11, %v1668_v16  ;;  %v1624_v41 = vrot.slane %v2508_v44, %v2499_v18  ;;  %v1698_v49 = vrot.slane %v1697_v26, 1 }
 0x131   : >> { %v1676_v46 = vmax.f32 %v1674_v3, %v1675_v4  ;;  %v1657_v35 = vmax.f32 %v1655_v62, %v1656_v27  ;;  %v1631_v52 = vrot.slane %v1617_v20, %v2499_v18  ;;  %v1560_v48 = vmax.f32 %v1552_v28, %v1556_v13 }
 0x132   : >> { %v1663_v29 = vrot.slane %v1662_v40, 1  ;;  %v1670_v33 = vrot.slane %v1669_v43, 1  ;;  %v1632_v56 = vcombine.high %v1624_v41, %v1624_v41  ;;  %v1705_v47 = vrot.slane %v1704_v45, 1 }
 0x133   : >> { %v1677_v53 = vrot.slane %v1676_v46, 1  ;;  %v1633_v30 = vcombine.high %v1631_v52, %v1631_v52  ;;  %v1600_v34 = vcombine.high %v1560_v48, %v1560_v48  ;;  %v1735_v44 = vsel %vm1650_vm1, %v1624_v41, -inf }
 0x134   : >> { %v1664_v22 = vmax.f32 %v1662_v40, %v1663_v29  ;;  %v1671_v32 = vmax.f32 %v1669_v43, %v1670_v33  ;;  %v1685_v54 = vmax.f32 %v1683_v17, %v1684_v21  ;;  %v1692_v58 = vmax.f32 %v1690_v24, %v1691_v31 }
 0x135   : >> { %v1678_v57 = vmax.f32 %v1676_v46, %v1677_v53  ;;  %v1742_v36 = vsel %vm1650_vm1, %v1632_v56, -inf  ;;  %v1699_v50 = vmax.f32 %v1697_v26, %v1698_v49  ;;  %v1749_v61 = vsel %vm1650_vm1, %v1631_v52, -inf }
 0x136   : >> { %v1780_v37 = vsel %vm1779_vm2, %v1664_v22, %v1657_v35  ;;  %v1607_v7 = vrot.slane %v1560_v48, %v2499_v18  ;;  %v1736_v6 = vrot.slane %v1735_v44, 4  ;;  %v1756_v10 = vsel %vm1650_vm1, %v1633_v30, -inf }
 0x137   : >> { %v1782_v59 = vsel %vm1781_vm3, %v1671_v32, %v1780_v37  ;;  %v1614_v38 = vrot.slane %v1600_v34, %v2499_v18  ;;  %v1706_v55 = vmax.f32 %v1704_v45, %v1705_v47  ;;  %v1743_v51 = vrot.slane %v1742_v36, 4 }
 0x138   : >> { %v1784_v63 = vsel %vm1783_vm4, %v1678_v57, %v1782_v59  ;;  %v1615_v5 = vcombine.high %v1607_v7, %v1607_v7  ;;  %v1750_v39 = vrot.slane %v1749_v61, 4  ;;  %v1757_v60 = vrot.slane %v1756_v10, 4 }
 0x139   : >> { %v1786_v9 = vsel %vm1785_vm5, %v1685_v54, %v1784_v63  ;;  %v1616_v15 = vcombine.high %v1614_v38, %v1614_v38  ;;  %v1707_v25 = vsel %vm1650_vm1, %v1607_v7, -inf  ;;  %v1737_v62 = vmax.f32 %v1735_v44, %v1736_v6 }
 0x13a   : >> { %v1788_v8 = vsel %vm1787_vm6, %v1692_v58, %v1786_v9  ;;  %v1708_v18 = vrot.slane %v1707_v25, 4  ;;  %v1714_v12 = vsel %vm1650_vm1, %v1615_v5, -inf  ;;  %v1744_v11 = vmax.f32 %v1742_v36, %v1743_v51 }
 0x13b   : >> { %v1790_v23 = vsel %vm1789_vm7, %v1699_v50, %v1788_v8  ;;  %v1715_v14 = vrot.slane %v1714_v12, 4  ;;  %v1721_v17 = vsel %vm1650_vm1, %v1614_v38, -inf  ;;  %v1751_v24 = vmax.f32 %v1749_v61, %v1750_v39 }
 0x13c   : >> { %v1792_v42 = vsel %vm1791_vm8, %v1706_v55, %v1790_v23  ;;  %v1709_v2 = vmax.f32 %v1707_v25, %v1708_v18  ;;  %v1722_v19 = vrot.slane %v1721_v17, 4  ;;  %v1758_v16 = vmax.f32 %v1756_v10, %v1757_v60 }
 0x13d   : >> { %1804 = vst [vmem:[%s2541_s27] sm:$0xff] %v1792_v42  ;;  %v1716_v3 = vmax.f32 %v1714_v12, %v1715_v14  ;;  %v1728_v26 = vsel %vm1650_vm1, %v1616_v15, -inf  ;;  %v1738_v27 = vrot.slane %v1737_v62, 2  ;;  %v1745_v40 = vrot.slane %v1744_v11, 2 }
 0x13e   : >> { %v1710_v13 = vrot.slane %v1709_v2, 2  ;;  %v1723_v28 = vmax.f32 %v1721_v17, %v1722_v19  ;;  %v1729_v4 = vrot.slane %v1728_v26, 4  ;;  %v1752_v21 = vrot.slane %v1751_v24, 2 }
 0x13f   : >> { %v1717_v43 = vrot.slane %v1716_v3, 2  ;;  %v1759_v20 = vrot.slane %v1758_v16, 2  ;;  %v1739_v46 = vmax.f32 %v1737_v62, %v1738_v27  ;;  %v1746_v35 = vmax.f32 %v1744_v11, %v1745_v40 }
 0x140   : >> { %v1711_v31 = vmax.f32 %v1709_v2, %v1710_v13  ;;  %v1724_v45 = vrot.slane %v1723_v28, 2  ;;  %v1730_v33 = vmax.f32 %v1728_v26, %v1729_v4  ;;  %v1753_v22 = vmax.f32 %v1751_v24, %v1752_v21 }
 0x141   : >> { %v1718_v29 = vmax.f32 %v1716_v3, %v1717_v43  ;;  %v1760_v53 = vmax.f32 %v1758_v16, %v1759_v20  ;;  %v1740_v47 = vrot.slane %v1739_v46, 1  ;;  %v1747_v37 = vrot.slane %v1746_v35, 1 }
 0x142   : >> { %v1712_v41 = vrot.slane %v1711_v31, 1  ;;  %v1725_v49 = vmax.f32 %v1723_v28, %v1724_v45  ;;  %v1731_v48 = vrot.slane %v1730_v33, 2  ;;  %v1754_v58 = vrot.slane %v1753_v22, 1 }
 0x143   : >> { %v1719_v52 = vrot.slane %v1718_v29, 1  ;;  %v1761_v36 = vrot.slane %v1760_v53, 1  ;;  %v1741_v63 = vmax.f32 %v1739_v46, %v1740_v47  ;;  %v1748_v61 = vmax.f32 %v1746_v35, %v1747_v37 }
 0x144   : >> { %v1726_v32 = vrot.slane %v1725_v49, 1  ;;  %v1713_v56 = vmax.f32 %v1711_v31, %v1712_v41  ;;  %v1732_v34 = vmax.f32 %v1730_v33, %v1731_v48  ;;  %v1755_v9 = vmax.f32 %v1753_v22, %v1754_v58 }
 0x145   : >> { %v1720_v30 = vmax.f32 %v1718_v29, %v1719_v52  ;;  %v1762_v10 = vmax.f32 %v1760_v53, %v1761_v36 }
 0x146   : >> { %v1727_v57 = vmax.f32 %v1725_v49, %v1726_v32  ;;  %v1733_v44 = vrot.slane %v1732_v34, 1 }
 0x147   : >> { %v1793_v54 = vsel %vm1779_vm2, %v1720_v30, %v1713_v56 }
 0x148   : >> { %v1794_v59 = vsel %vm1781_vm3, %v1727_v57, %v1793_v54  ;;  %v1734_v50 = vmax.f32 %v1732_v34, %v1733_v44 }
 0x14a   : >> { %v1795_v7 = vsel %vm1783_vm4, %v1734_v50, %v1794_v59 }
 0x14b   : >> { %v1796_v6 = vsel %vm1785_vm5, %v1741_v63, %v1795_v7  ;;  %204 = sbr.rel (!%p202_p4) target bundleno = 15 (0xf), region = 85 }
 0x14c   : >> { %v1797_v38 = vsel %vm1787_vm6, %v1748_v61, %v1796_v6 }
 0x14d   : >> { %v1798_v55 = vsel %vm1789_vm7, %v1755_v9, %v1797_v38 }
 0x14e   : >> { %v1799_v8 = vsel %vm1791_vm8, %v1762_v10, %v1798_v55 }
 0x14f   : >> { %1805 = vst [vmem:[%s2541_s27 + $0x8] sm:$0xff] %v1799_v8 }
 0x150 PF: > { %s14_s15 = sadd.s32 1, %s2263_s15  }
 0x151   : > { %p11_p5 = scmp.ge.s32.totalorder %s14_s15, 4  }
 0x153   :  { %13 = sbr.rel (!%p11_p5) target bundleno = 1 (0x1), region = 96 }

// kernel: convnet_forward.5
= control target key start
LH: loop header
LB: loop body
LE: loop exit
PB: predicated region body
PF: predicated region fallthrough
CT: control target
= control target key end

     0   :  { %v658_v30 = vmov 1983009808   ;;  %v158_v32 = vlaneseq  ;;  %s1082_s0 = inlined_call_operand.vmem [shape: f32[2,1024], index: 0, kind: input, shape index: {}]   ;;  %s1083_s1 = inlined_call_operand.vmem [shape: f32[1024,128], index: 1, kind: input, shape index: {}]   ;;  %s1084_s2 = inlined_call_operand.vmem [shape: f32[1,128], index: 2, kind: input, shape index: {}]   ;;  %s1085_s3 = inlined_call_operand.hbm [shape: f32[2,128], index: 3, kind: output, shape index: {}]  }
   0x1   :  { %v48_v0 = vld [vmem:[%s1083_s1 + $0xf8] sm:$0xff]  ;;  %v47_v4 = vld [vmem:[%s1083_s1 + $0xf0] sm:$0xff]  ;;  %v46_v8 = vld [vmem:[%s1083_s1 + $0xe8] sm:$0xff]  ;;  %v156_v31 = vunpack.c.l.s4 %v658_v30 }
   0x2   :  { %v80_v1 = vld [vmem:[%s1083_s1 + $0x1f8] sm:$0xff]  ;;  %492 = vmatprep.subr.mxu0 %v48_v0  ;;  %v79_v5 = vld [vmem:[%s1083_s1 + $0x1f0] sm:$0xff]  ;;  %v78_v9 = vld [vmem:[%s1083_s1 + $0x1e8] sm:$0xff]  ;;  %v159_v42 = vshrl.u32 %v158_v32, 7 }
   0x3   :  { %v32_v2 = vld [vmem:[%s1083_s1 + $0x78] sm:$0xff]  ;;  %527 = vmatprep.subr.mxu1 %v80_v1  ;;  %v31_v6 = vld [vmem:[%s1083_s1 + $0x70] sm:$0xff]  ;;  %v30_v10 = vld [vmem:[%s1083_s1 + $0x68] sm:$0xff]  ;;  %v157_v41 = vunpack.c.0.s8 %v156_v31 }
   0x4   :  { %v64_v3 = vld [vmem:[%s1083_s1 + $0x178] sm:$0xff]  ;;  %493 = vmatpush3.msra.mxu0 %v32_v2  ;;  %v63_v7 = vld [vmem:[%s1083_s1 + $0x170] sm:$0xff]  ;;  %v62_v11 = vld [vmem:[%s1083_s1 + $0x168] sm:$0xff] }
   0x5   :  { %528 = vmatpush3.msra.mxu1 %v64_v3  ;;  %494 = vmatprep.subr.mxu0 %v47_v4  ;;  %v45_v12 = vld [vmem:[%s1083_s1 + $0xe0] sm:$0xff]  ;;  %v44_v16 = vld [vmem:[%s1083_s1 + $0xd8] sm:$0xff]  ;;  %v43_v20 = vld [vmem:[%s1083_s1 + $0xd0] sm:$0xff]  ;;  %v818_v51 = vsub.s32 %v157_v41, %v159_v42 }
   0x6   :  { %529 = vmatprep.subr.mxu1 %v79_v5  ;;  %495 = vmatpush3.msra.mxu0 %v31_v6  ;;  %v77_v13 = vld [vmem:[%s1083_s1 + $0x1e0] sm:$0xff]  ;;  %v76_v17 = vld [vmem:[%s1083_s1 + $0x1d8] sm:$0xff]  ;;  %v75_v21 = vld [vmem:[%s1083_s1 + $0x1d0] sm:$0xff] }
   0x7   :  { %530 = vmatpush3.msra.mxu1 %v63_v7  ;;  %496 = vmatprep.subr.mxu0 %v46_v8  ;;  %v29_v14 = vld [vmem:[%s1083_s1 + $0x60] sm:$0xff]  ;;  %v28_v18 = vld [vmem:[%s1083_s1 + $0x58] sm:$0xff]  ;;  %v27_v22 = vld [vmem:[%s1083_s1 + $0x50] sm:$0xff] }
   0x8   :  { %531 = vmatprep.subr.mxu1 %v78_v9  ;;  %v61_v15 = vld [vmem:[%s1083_s1 + $0x160] sm:$0xff]  ;;  %497 = vmatpush3.msra.mxu0 %v30_v10  ;;  %v60_v19 = vld [vmem:[%s1083_s1 + $0x158] sm:$0xff]  ;;  %v59_v23 = vld [vmem:[%s1083_s1 + $0x150] sm:$0xff] }
   0x9   :  { %532 = vmatpush3.msra.mxu1 %v62_v11  ;;  %498 = vmatprep.subr.mxu0 %v45_v12  ;;  %v42_v24 = vld [vmem:[%s1083_s1 + $0xc8] sm:$0xff]  ;;  %v41_v28 = vld [vmem:[%s1083_s1 + $0xc0] sm:$0xff]  ;;  %v40_v35 = vld [vmem:[%s1083_s1 + $0xb8] sm:$0xff] }
   0xa   :  { %533 = vmatprep.subr.mxu1 %v77_v13  ;;  %499 = vmatpush3.msra.mxu0 %v29_v14  ;;  %v74_v25 = vld [vmem:[%s1083_s1 + $0x1c8] sm:$0xff]  ;;  %v73_v29 = vld [vmem:[%s1083_s1 + $0x1c0] sm:$0xff]  ;;  %v72_v36 = vld [vmem:[%s1083_s1 + $0x1b8] sm:$0xff] }
   0xb   :  { %534 = vmatpush3.msra.mxu1 %v61_v15  ;;  %500 = vmatprep.subr.mxu0 %v44_v16  ;;  %v26_v26 = vld [vmem:[%s1083_s1 + $0x48] sm:$0xff]  ;;  %v25_v33 = vld [vmem:[%s1083_s1 + $0x40] sm:$0xff]  ;;  %v24_v37 = vld [vmem:[%s1083_s1 + $0x38] sm:$0xff] }
   0xc   :  { %535 = vmatprep.subr.mxu1 %v76_v17  ;;  %501 = vmatpush3.msra.mxu0 %v28_v18  ;;  %v58_v27 = vld [vmem:[%s1083_s1 + $0x148] sm:$0xff]  ;;  %v57_v34 = vld [vmem:[%s1083_s1 + $0x140] sm:$0xff]  ;;  %v56_v38 = vld [vmem:[%s1083_s1 + $0x138] sm:$0xff] }
   0xd   :  { %536 = vmatpush3.msra.mxu1 %v60_v19  ;;  %502 = vmatprep.subr.mxu0 %v43_v20  ;;  %v39_v39 = vld [vmem:[%s1083_s1 + $0xb0] sm:$0xff]  ;;  %v38_v45 = vld [vmem:[%s1083_s1 + $0xa8] sm:$0xff]  ;;  %v37_v49 = vld [vmem:[%s1083_s1 + $0xa0] sm:$0xff] }
   0xe   :  { %537 = vmatprep.subr.mxu1 %v75_v21  ;;  %503 = vmatpush3.msra.mxu0 %v27_v22  ;;  %v71_v40 = vld [vmem:[%s1083_s1 + $0x1b0] sm:$0xff]  ;;  %v70_v46 = vld [vmem:[%s1083_s1 + $0x1a8] sm:$0xff]  ;;  %v69_v50 = vld [vmem:[%s1083_s1 + $0x1a0] sm:$0xff] }
   0xf   :  { %538 = vmatpush3.msra.mxu1 %v59_v23  ;;  %504 = vmatprep.subr.mxu0 %v42_v24  ;;  %v23_v43 = vld [vmem:[%s1083_s1 + $0x30] sm:$0xff]  ;;  %v22_v47 = vld [vmem:[%s1083_s1 + $0x28] sm:$0xff]  ;;  %v21_v52 = vld [vmem:[%s1083_s1 + $0x20] sm:$0xff] }
  0x10   :  { %539 = vmatprep.subr.mxu1 %v74_v25  ;;  %505 = vmatpush3.msra.mxu0 %v26_v26  ;;  %v55_v44 = vld [vmem:[%s1083_s1 + $0x130] sm:$0xff]  ;;  %v54_v48 = vld [vmem:[%s1083_s1 + $0x128] sm:$0xff]  ;;  %v53_v53 = vld [vmem:[%s1083_s1 + $0x120] sm:$0xff] }
  0x11   :  { %540 = vmatpush3.msra.mxu1 %v58_v27  ;;  %506 = vmatprep.subr.mxu0 %v41_v28  ;;  %v15_v54 = vld [vmem:[%s1082_s0] sm:$0xff]  ;;  %v36_v55 = vld [vmem:[%s1083_s1 + $0x98] sm:$0xff]  ;;  %v35_v60 = vld [vmem:[%s1083_s1 + $0x90] sm:$0xff] }
  0x12   :  { %541 = vmatprep.subr.mxu1 %v73_v29  ;;  %507 = vmatpush3.msra.mxu0 %v25_v33  ;;  %v68_v56 = vld [vmem:[%s1083_s1 + $0x198] sm:$0xff]  ;;  %v154_v57 = vcombine.high %v15_v54, %v15_v54  ;;  %v67_v61 = vld [vmem:[%s1083_s1 + $0x190] sm:$0xff]  ;;  %v161_v62 = vrot.slane %v15_v54, %v818_v51  ;;  %v34_v1 = vld [vmem:[%s1083_s1 + $0x88] sm:$0xff] }
  0x13   :  { %542 = vmatpush3.msra.mxu1 %v57_v34  ;;  %508 = vmatprep.subr.mxu0 %v40_v35  ;;  %v20_v58 = vld [vmem:[%s1083_s1 + $0x18] sm:$0xff]  ;;  %v19_v63 = vld [vmem:[%s1083_s1 + $0x10] sm:$0xff]  ;;  %v66_v2 = vld [vmem:[%s1083_s1 + $0x188] sm:$0xff] }
  0x14   :  { %543 = vmatprep.subr.mxu1 %v72_v36  ;;  %509 = vmatpush3.msra.mxu0 %v24_v37  ;;  %v52_v59 = vld [vmem:[%s1083_s1 + $0x118] sm:$0xff]  ;;  %v51_v0 = vld [vmem:[%s1083_s1 + $0x110] sm:$0xff]  ;;  %v168_v3 = vrot.slane %v154_v57, %v818_v51  ;;  %v18_v4 = vld [vmem:[%s1083_s1 + $0x8] sm:$0xff]  ;;  %v169_v8 = vcombine.high %v161_v62, %v161_v62 }
  0x15   :  { %544 = vmatpush3.msra.mxu1 %v56_v38  ;;  %510 = vmatprep.subr.mxu0 %v39_v39  ;;  %v50_v5 = vld [vmem:[%s1083_s1 + $0x108] sm:$0xff]  ;;  %v33_v6 = vld [vmem:[%s1083_s1 + $0x80] sm:$0xff]  ;;  %v112_v12 = vld [vmem:[%s1083_s1 + $0x2f8] sm:$0xff] }
  0x16   :  { %545 = vmatprep.subr.mxu1 %v71_v40  ;;  %511 = vmatpush3.msra.mxu0 %v23_v43  ;;  %v65_v7 = vld [vmem:[%s1083_s1 + $0x180] sm:$0xff]  ;;  %v170_v11 = vcombine.high %v168_v3, %v168_v3  ;;  %v144_v13 = vld [vmem:[%s1083_s1 + $0x3f8] sm:$0xff]  ;;  %v111_v16 = vld [vmem:[%s1083_s1 + $0x2f0] sm:$0xff] }
  0x17   :  { %546 = vmatpush3.msra.mxu1 %v55_v44  ;;  %512 = vmatprep.subr.mxu0 %v38_v45  ;;  %v17_v9 = vld [vmem:[%s1083_s1] sm:$0xff]  ;;  %v96_v14 = vld [vmem:[%s1083_s1 + $0x278] sm:$0xff]  ;;  %v143_v17 = vld [vmem:[%s1083_s1 + $0x3f0] sm:$0xff] }
  0x18   :  { %547 = vmatprep.subr.mxu1 %v70_v46  ;;  %513 = vmatpush3.msra.mxu0 %v22_v47  ;;  %v49_v10 = vld [vmem:[%s1083_s1 + $0x100] sm:$0xff]  ;;  %v128_v15 = vld [vmem:[%s1083_s1 + $0x378] sm:$0xff]  ;;  %v95_v18 = vld [vmem:[%s1083_s1 + $0x270] sm:$0xff] }
  0x19   :  { %548 = vmatpush3.msra.mxu1 %v54_v48  ;;  %514 = vmatprep.subr.mxu0 %v37_v49  ;;  %v127_v19 = vld [vmem:[%s1083_s1 + $0x370] sm:$0xff]  ;;  %v110_v20 = vld [vmem:[%s1083_s1 + $0x2e8] sm:$0xff]  ;;  %v109_v24 = vld [vmem:[%s1083_s1 + $0x2e0] sm:$0xff] }
  0x1a   :  { %549 = vmatprep.subr.mxu1 %v69_v50  ;;  %515 = vmatpush3.msra.mxu0 %v21_v52  ;;  %v142_v21 = vld [vmem:[%s1083_s1 + $0x3e8] sm:$0xff]  ;;  %v141_v25 = vld [vmem:[%s1083_s1 + $0x3e0] sm:$0xff]  ;;  %v108_v28 = vld [vmem:[%s1083_s1 + $0x2d8] sm:$0xff] }
  0x1b   :  { %550 = vmatpush3.msra.mxu1 %v53_v53  ;;  %516 = vmatprep.subr.mxu0 %v36_v55  ;;  %v94_v22 = vld [vmem:[%s1083_s1 + $0x268] sm:$0xff]  ;;  %v93_v26 = vld [vmem:[%s1083_s1 + $0x260] sm:$0xff]  ;;  %v140_v29 = vld [vmem:[%s1083_s1 + $0x3d8] sm:$0xff] }
  0x1c   :  { %551 = vmatprep.subr.mxu1 %v68_v56  ;;  %517 = vmatpush3.msra.mxu0 %v20_v58  ;;  %v126_v23 = vld [vmem:[%s1083_s1 + $0x368] sm:$0xff]  ;;  %v125_v27 = vld [vmem:[%s1083_s1 + $0x360] sm:$0xff]  ;;  %v92_v30 = vld [vmem:[%s1083_s1 + $0x258] sm:$0xff] }
  0x1d   :  { %552 = vmatpush3.msra.mxu1 %v52_v59  ;;  %518 = vmatprep.subr.mxu0 %v35_v60  ;;  %v124_v31 = vld [vmem:[%s1083_s1 + $0x358] sm:$0xff]  ;;  %v107_v32 = vld [vmem:[%s1083_s1 + $0x2d0] sm:$0xff] }
  0x1e   :  { %553 = vmatprep.subr.mxu1 %v67_v61  ;;  %519 = vmatpush3.msra.mxu0 %v19_v63  ;;  %v139_v33 = vld [vmem:[%s1083_s1 + $0x3d0] sm:$0xff] }
  0x1f   :  { %554 = vmatpush3.msra.mxu1 %v51_v0  ;;  %520 = vmatprep.subr.mxu0 %v34_v1  ;;  %v91_v34 = vld [vmem:[%s1083_s1 + $0x250] sm:$0xff] }
  0x20   :  { %555 = vmatprep.subr.mxu1 %v66_v2  ;;  %521 = vmatpush3.msra.mxu0 %v18_v4  ;;  %v123_v35 = vld [vmem:[%s1083_s1 + $0x350] sm:$0xff] }
  0x21   :  { %556 = vmatpush3.msra.mxu1 %v50_v5  ;;  %522 = vmatprep.subr.mxu0 %v33_v6 }
  0x22   :  { %557 = vmatprep.subr.mxu1 %v65_v7  ;;  %523 = vmatpush3.msra.mxu0 %v17_v9 }
  0x23   :  { %260 = vmatprep.mubr.f32.mxu0 %v169_v8  ;;  %558 = vmatpush3.msra.mxu1 %v49_v10 }
  0x24   :  { %261 = vmatmul.mubr.f32.vlgmr.msra.gmra.mxu0 %v161_v62  ;;  %330 = vmatprep.mubr.f32.mxu1 %v170_v11 }
  0x25   :  { %562 = vmatprep.subr.mxu0 %v112_v12  ;;  %597 = vmatprep.subr.mxu1 %v144_v13 }
  0x26   :  { %331 = vmatmul.mubr.f32.vlgmr.msra.gmra.mxu1 %v168_v3  ;;  %563 = vmatpush3.msra.mxu0 %v96_v14 }
  0x27   :  { %598 = vmatpush3.msra.mxu1 %v128_v15  ;;  %564 = vmatprep.subr.mxu0 %v111_v16 }
  0x28   :  { %599 = vmatprep.subr.mxu1 %v143_v17  ;;  %565 = vmatpush3.msra.mxu0 %v95_v18 }
  0x29   :  { %600 = vmatpush3.msra.mxu1 %v127_v19  ;;  %566 = vmatprep.subr.mxu0 %v110_v20 }
  0x2a   :  { %601 = vmatprep.subr.mxu1 %v142_v21  ;;  %567 = vmatpush3.msra.mxu0 %v94_v22 }
  0x2b   :  { %602 = vmatpush3.msra.mxu1 %v126_v23  ;;  %568 = vmatprep.subr.mxu0 %v109_v24 }
  0x2c   :  { %603 = vmatprep.subr.mxu1 %v141_v25  ;;  %569 = vmatpush3.msra.mxu0 %v93_v26 }
  0x2d   :  { %604 = vmatpush3.msra.mxu1 %v125_v27  ;;  %570 = vmatprep.subr.mxu0 %v108_v28 }
  0x2e   :  { %605 = vmatprep.subr.mxu1 %v140_v29 }
  0x2f   :  { %8 = vsyncpa [#allocation3], 0  ;;  %571 = vmatpush3.msra.mxu0 %v92_v30  ;;  %606 = vmatpush3.msra.mxu1 %v124_v31  ;;  %v106_v36 = vld [vmem:[%s1083_s1 + $0x2c8] sm:$0xff]  ;;  %v105_v40 = vld [vmem:[%s1083_s1 + $0x2c0] sm:$0xff] }
  0x30   :  { %v138_v37 = vld [vmem:[%s1083_s1 + $0x3c8] sm:$0xff]  ;;  %572 = vmatprep.subr.mxu0 %v107_v32  ;;  %607 = vmatprep.subr.mxu1 %v139_v33  ;;  %v137_v41 = vld [vmem:[%s1083_s1 + $0x3c0] sm:$0xff]  ;;  %v104_v44 = vld [vmem:[%s1083_s1 + $0x2b8] sm:$0xff] }
  0x31   :  { %v90_v38 = vld [vmem:[%s1083_s1 + $0x248] sm:$0xff]  ;;  %573 = vmatpush3.msra.mxu0 %v91_v34  ;;  %608 = vmatpush3.msra.mxu1 %v123_v35  ;;  %v89_v42 = vld [vmem:[%s1083_s1 + $0x240] sm:$0xff]  ;;  %v136_v45 = vld [vmem:[%s1083_s1 + $0x3b8] sm:$0xff] }
  0x32   :  { %v122_v39 = vld [vmem:[%s1083_s1 + $0x348] sm:$0xff]  ;;  %574 = vmatprep.subr.mxu0 %v106_v36  ;;  %609 = vmatprep.subr.mxu1 %v138_v37  ;;  %v121_v43 = vld [vmem:[%s1083_s1 + $0x340] sm:$0xff]  ;;  %v88_v46 = vld [vmem:[%s1083_s1 + $0x238] sm:$0xff] }
  0x33   :  { %575 = vmatpush3.msra.mxu0 %v90_v38  ;;  %610 = vmatpush3.msra.mxu1 %v122_v39  ;;  %v120_v47 = vld [vmem:[%s1083_s1 + $0x338] sm:$0xff]  ;;  %v103_v48 = vld [vmem:[%s1083_s1 + $0x2b0] sm:$0xff]  ;;  %v102_v53 = vld [vmem:[%s1083_s1 + $0x2a8] sm:$0xff] }
  0x34   :  { %576 = vmatprep.subr.mxu0 %v105_v40  ;;  %611 = vmatprep.subr.mxu1 %v137_v41  ;;  %v135_v49 = vld [vmem:[%s1083_s1 + $0x3b0] sm:$0xff]  ;;  %v134_v54 = vld [vmem:[%s1083_s1 + $0x3a8] sm:$0xff]  ;;  %v101_v58 = vld [vmem:[%s1083_s1 + $0x2a0] sm:$0xff] }
  0x35   :  { %577 = vmatpush3.msra.mxu0 %v89_v42  ;;  %612 = vmatpush3.msra.mxu1 %v121_v43  ;;  %v87_v50 = vld [vmem:[%s1083_s1 + $0x230] sm:$0xff]  ;;  %v16_v55 = vld [vmem:[%s1082_s0 + $0x8] sm:$0xff]  ;;  %v133_v59 = vld [vmem:[%s1083_s1 + $0x3a0] sm:$0xff] }
  0x36   :  { %578 = vmatprep.subr.mxu0 %v104_v44  ;;  %613 = vmatprep.subr.mxu1 %v136_v45  ;;  %v119_v52 = vld [vmem:[%s1083_s1 + $0x330] sm:$0xff]  ;;  %v86_v56 = vld [vmem:[%s1083_s1 + $0x228] sm:$0xff]  ;;  %v85_v60 = vld [vmem:[%s1083_s1 + $0x220] sm:$0xff]  ;;  %v171_v62 = vcombine.high %v16_v55, %v16_v55  ;;  %v178_v5 = vrot.slane %v16_v55, %v818_v51 }
  0x37   :  { %579 = vmatpush3.msra.mxu0 %v88_v46  ;;  %614 = vmatpush3.msra.mxu1 %v120_v47  ;;  %v118_v57 = vld [vmem:[%s1083_s1 + $0x328] sm:$0xff]  ;;  %v117_v61 = vld [vmem:[%s1083_s1 + $0x320] sm:$0xff]  ;;  %v100_v63 = vld [vmem:[%s1083_s1 + $0x298] sm:$0xff] }
  0x38   :  { %580 = vmatprep.subr.mxu0 %v103_v48  ;;  %615 = vmatprep.subr.mxu1 %v135_v49  ;;  %v132_v0 = vld [vmem:[%s1083_s1 + $0x398] sm:$0xff]  ;;  %v99_v3 = vld [vmem:[%s1083_s1 + $0x290] sm:$0xff]  ;;  %v185_v8 = vrot.slane %v171_v62, %v818_v51  ;;  %v98_v9 = vld [vmem:[%s1083_s1 + $0x288] sm:$0xff]  ;;  %v186_v14 = vcombine.high %v178_v5, %v178_v5 }
  0x39   :  { %581 = vmatpush3.msra.mxu0 %v87_v50  ;;  %616 = vmatpush3.msra.mxu1 %v119_v52  ;;  %v84_v1 = vld [vmem:[%s1083_s1 + $0x218] sm:$0xff]  ;;  %v131_v4 = vld [vmem:[%s1083_s1 + $0x390] sm:$0xff]  ;;  %v130_v10 = vld [vmem:[%s1083_s1 + $0x388] sm:$0xff] }
  0x3a   :  { %582 = vmatprep.subr.mxu0 %v102_v53  ;;  %617 = vmatprep.subr.mxu1 %v134_v54  ;;  %v116_v2 = vld [vmem:[%s1083_s1 + $0x318] sm:$0xff]  ;;  %v83_v6 = vld [vmem:[%s1083_s1 + $0x210] sm:$0xff]  ;;  %v82_v11 = vld [vmem:[%s1083_s1 + $0x208] sm:$0xff]  ;;  %v187_v16 = vcombine.high %v185_v8, %v185_v8 }
  0x3b   :  { %583 = vmatpush3.msra.mxu0 %v86_v56  ;;  %618 = vmatpush3.msra.mxu1 %v118_v57  ;;  %v115_v7 = vld [vmem:[%s1083_s1 + $0x310] sm:$0xff]  ;;  %v114_v51 = vld [vmem:[%s1083_s1 + $0x308] sm:$0xff]  ;;  %v97_v12 = vld [vmem:[%s1083_s1 + $0x280] sm:$0xff] }
  0x3c   :  { %584 = vmatprep.subr.mxu0 %v101_v58  ;;  %619 = vmatprep.subr.mxu1 %v133_v59  ;;  %v129_v13 = vld [vmem:[%s1083_s1 + $0x380] sm:$0xff] }
  0x3d   :  { %585 = vmatpush3.msra.mxu0 %v85_v60  ;;  %620 = vmatpush3.msra.mxu1 %v117_v61  ;;  %v81_v15 = vld [vmem:[%s1083_s1 + $0x200] sm:$0xff] }
  0x3e   :  { %586 = vmatprep.subr.mxu0 %v100_v63  ;;  %621 = vmatprep.subr.mxu1 %v132_v0  ;;  %v113_v17 = vld [vmem:[%s1083_s1 + $0x300] sm:$0xff]  ;;  %s659_s1 = smov [#allocation2]  }
  0x3f   :  { %587 = vmatpush3.msra.mxu0 %v84_v1  ;;  %622 = vmatpush3.msra.mxu1 %v116_v2  ;;  %v491_v22 = vld [vmem:[%s1084_s2] ss:$0 sm:$0xff]  ;;  %s483_s29 = sshll.u32 %s659_s1, 4  ;;  %s484_s29 = int_to_ptr.vmem [resolvable:$true] %s483_s29 }
  0x40   :  { %588 = vmatprep.subr.mxu0 %v99_v3  ;;  %623 = vmatprep.subr.mxu1 %v131_v4  ;;  %s636_s30 = scalar_lea.vmem %s484_s29, 32  ;;  %p641_p1 = scmp.lt.s32.totalorder %s484_s29, %s484_s29 }
  0x41   :  { %589 = vmatpush3.msra.mxu0 %v83_v6  ;;  %624 = vmatpush3.msra.mxu1 %v115_v7  ;;  %p637_p0 = scmp.ne.s32.totalorder %s484_s29, %s636_s30  ;;  %p642_p2 = scmp.lt.s32.totalorder %s636_s30, %s636_s30 }
  0x42   :  { %590 = vmatprep.subr.mxu0 %v98_v9  ;;  %625 = vmatprep.subr.mxu1 %v130_v10 }
  0x43   :  { %591 = vmatpush3.msra.mxu0 %v82_v11  ;;  %626 = vmatpush3.msra.mxu1 %v114_v51  ;;  %p643_p3 = por %p642_p2, %p641_p1 }
  0x44   :  { %592 = vmatprep.subr.mxu0 %v97_v12  ;;  %627 = vmatprep.subr.mxu1 %v129_v13 }
  0x45   :  { %593 = vmatpush3.msra.mxu0 %v81_v15  ;;  %400 = vmatprep.mubr.f32.mxu0 %v186_v14  ;;  %p644_p4 = pnand %p643_p3, %p637_p0 }
  0x46   :  { %628 = vmatpush3.msra.mxu1 %v113_v17  ;;  %470 = vmatprep.mubr.f32.mxu1 %v187_v16 }
  0x47   :  { %401 = vmatmul.mubr.f32.vlgmr.msra.gmra.mxu0 %v178_v5  ;;  %471 = vmatmul.mubr.f32.vlgmr.msra.gmra.mxu1 %v185_v8 }
  0xe4   :  { %v524_v18 = vpop.f32.mrf.mxu0 }
  0xe6   :  { %v559_v19 = vpop.f32.mrf.mxu1  ;;  %v525_v20 = vpop.f32.mrf.mxu0 }
  0xe7   :  { %v526_v21 = vadd.f32 %v525_v20, %v524_v18 }
  0xe8   :  { %v560_v23 = vpop.f32.mrf.mxu1 }
  0xe9   :  { %v263_v24 = vadd.f32 %v526_v21, %v491_v22  ;;  %v561_v25 = vadd.f32 %v560_v23, %v559_v19 }
  0xeb   :  { %v333_v30 = vadd.f32 %v561_v25, %v263_v24 }
 0x107   :  { %v594_v26 = vpop.f32.mrf.mxu0  ;;  %v629_v27 = vpop.f32.mrf.mxu1 }
 0x109   :  { %v595_v28 = vpop.f32.mrf.mxu0  ;;  %v630_v29 = vpop.f32.mrf.mxu1 }
 0x10a   :  { %v596_v31 = vadd.f32 %v595_v28, %v594_v26  ;;  %v631_v33 = vadd.f32 %v630_v29, %v629_v27 }
 0x10c   :  { %v403_v32 = vadd.f32 %v596_v31, %v333_v30 }
 0x10e   :  { %v473_v34 = vadd.f32 %v631_v33, %v403_v32 }
 0x110   :  { %476 = vst [vmem:[#allocation2] sm:$0x3] %v473_v34 }
 0x111   :  { %647 = shalt.err (!%p644_p4)
}
 0x112   :  { %486 = dma.vmem_to_hbm [thread:$0]  %s484_s29, 32, %s1085_s3, [#allocation3]  }
 0x113   :  { %656 = dma.done.wait [#allocation3], 32  }
 0x114   :  { %657 = vsyncadd [#allocation3], 4294967264 }
 0x115   :  { %490 = vsyncpa [#allocation3], 1 }

</bundles_post_ra>
